<compile_context>
chip_gen: v5e
topology: v5e:2x2
jax: 0.10.0
libtpu: 0.0.40
codegen_flags: <defaults>
</compile_context>

<pallas_src>
import functools

import jax
import jax.numpy as jnp
import numpy as np
from jax.experimental import pallas as pl
from jax.experimental.pallas import tpu as pltpu


# --------------------------------- fused kernel ---------------------------------
def _fused_kernel(x2d_ref, len_ref,
                  wih_f_ref, whh_f_ref, b_f_ref,
                  wih_b_ref, whh_b_ref, b_b_ref,
                  cwih_top_ref, cwih_bot_ref, cwhh_ref, cb_ref,
                  wlin_ref, blin_ref,
                  out_ref,
                  gin_f_ref, gin_b_ref,
                  *, T, Np, N, H, matmul_dtype):
    f32 = jnp.float32
    md = matmul_dtype

    # ---- hoisted input projections: one big MXU matmul per direction -----------
    x2d = x2d_ref[...].astype(md)                                  # (T*Np, E)
    gin_f_ref[...] = jnp.dot(x2d, wih_f_ref[...].astype(md),
                             preferred_element_type=f32) + b_f_ref[...]
    gin_b_ref[...] = jnp.dot(x2d, wih_b_ref[...].astype(md),
                             preferred_element_type=f32) + b_b_ref[...]

    lengths = len_ref[...]                                         # (Np, 1) int32
    whh_f = whh_f_ref[...].astype(md)                              # (H, 4H)
    whh_b = whh_b_ref[...].astype(md)

    def lstm_step(gates, c):
        # full-width nonlinearities; static slices only for the combine
        sig = jax.nn.sigmoid(gates)
        tnh = jnp.tanh(gates)
        i_g = sig[:, 0 * H:1 * H]
        f_g = sig[:, 1 * H:2 * H]
        g_g = tnh[:, 2 * H:3 * H]
        o_g = sig[:, 3 * H:4 * H]
        c_new = f_g * c + i_g * g_g
        h_new = o_g * jnp.tanh(c_new)
        return h_new, c_new

    zeros = jnp.zeros((Np, H), f32)

    # ---- bidirectional word-level LSTM, fwd/bwd chains interleaved --------------
    def bidir_body(step, carry):
        h_f, c_f, h_b, c_b = carry
        # forward chain processes time step `step`
        g_f = gin_f_ref[pl.ds(step * Np, Np), :] + jnp.dot(
            h_f.astype(md), whh_f, preferred_element_type=f32)
        hf_new, cf_new = lstm_step(g_f, c_f)
        valid_f = lengths > step                                   # (Np,1) bool
        h_f = jnp.where(valid_f, hf_new, h_f)
        c_f = jnp.where(valid_f, cf_new, c_f)
        # backward chain processes time step T-1-step
        t_b = T - 1 - step
        g_b = gin_b_ref[pl.ds(t_b * Np, Np), :] + jnp.dot(
            h_b.astype(md), whh_b, preferred_element_type=f32)
        hb_new, cb_new = lstm_step(g_b, c_b)
        valid_b = lengths > t_b
        h_b = jnp.where(valid_b, hb_new, h_b)
        c_b = jnp.where(valid_b, cb_new, c_b)
        return h_f, c_f, h_b, c_b

    h_f, _, h_b, _ = jax.lax.fori_loop(
        0, T, bidir_body, (zeros, zeros, zeros, zeros), unroll=(T <= 32))

    # ---- causality LSTM over DUs (batch=1, sequential over N DUs) ---------------
    # feat = [h_f ; h_b] is never materialized: its input projection is split.
    gc = (jnp.dot(h_f.astype(md), cwih_top_ref[...].astype(md),
                  preferred_element_type=f32)
          + jnp.dot(h_b.astype(md), cwih_bot_ref[...].astype(md),
                    preferred_element_type=f32)
          + cb_ref[...])                                           # (Np, 4H)

    cwhh = cwhh_ref[...].astype(md)
    row_ids = jax.lax.broadcasted_iota(jnp.int32, (Np, 1), 0)      # (Np, 1)

    def caus_body(t, carry):
        h, c, hs = carry                                           # (1,H),(1,H),(Np,H)
        sel = row_ids == t                                         # (Np,1)
        x_t = jnp.sum(jnp.where(sel, gc, 0.0), axis=0, keepdims=True)   # (1,4H)
        gates = x_t + jnp.dot(h.astype(md), cwhh, preferred_element_type=f32)
        h, c = lstm_step(gates, c)
        hs = jnp.where(sel, h, hs)                                 # scatter row t
        return h, c, hs

    init = (jnp.zeros((1, H), f32), jnp.zeros((1, H), f32), jnp.zeros((Np, H), f32))
    _, _, hs = jax.lax.fori_loop(0, N, caus_body, init, unroll=(N <= 32))

    # ---- Linear(H, 2) + log_softmax (one matmul after the loop) -----------------
    logits = jnp.dot(hs.astype(md), wlin_ref[...].astype(md),
                     preferred_element_type=f32) + blin_ref[...]   # (Np, 2)
    m = jnp.max(logits, axis=-1, keepdims=True)
    lse = m + jnp.log(jnp.sum(jnp.exp(logits - m), axis=-1, keepdims=True))
    out_ref[...] = logits - lse


# ------------------------------------ wrapper ------------------------------------
def bilstm_causal_forward(x, lengths, params, matmul_dtype=jnp.float32):
    """x: (N_du, T, E) padded word embeddings; lengths: (N_du,) int32 (all >= 1)."""
    N, T, E = x.shape
    H = params["hidden_dim"]
    Np = int(np.ceil(N / 8)) * 8              # pad DU axis to a multiple of 8 sublanes

    x_pad = jnp.zeros((Np, T, E), jnp.float32).at[:N].set(x.astype(jnp.float32))
    len_pad = jnp.zeros((Np, 1), jnp.int32).at[:N, 0].set(lengths.astype(jnp.int32))
    # time-major, flattened over (T, Np): row t*Np + n holds word t of DU n
    x2d = jnp.transpose(x_pad, (1, 0, 2)).reshape(T * Np, E)

    kernel = functools.partial(_fused_kernel, T=T, Np=Np, N=N, H=H,
                               matmul_dtype=matmul_dtype)
    vmem = pl.BlockSpec(memory_space=pltpu.MemorySpace.VMEM)

    out = pl.pallas_call(
        kernel,
        out_shape=jax.ShapeDtypeStruct((Np, 2), jnp.float32),
        in_specs=[vmem] * 14,
        out_specs=vmem,
        scratch_shapes=[pltpu.VMEM((T * Np, 4 * H), jnp.float32),   # fwd input gates
                        pltpu.VMEM((T * Np, 4 * H), jnp.float32)],  # bwd input gates
        compiler_params=pltpu.CompilerParams(vmem_limit_bytes=32 * 1024 * 1024),
    )(x2d, len_pad,
      params["du_wih_f"], params["du_whh_f"], params["du_b_f"],
      params["du_wih_b"], params["du_whh_b"], params["du_b_b"],
      params["c_wih_top"], params["c_wih_bot"], params["c_whh"], params["c_b"],
      params["lin_w"], params["lin_b"])

    # TODO(synk): the empty-DU path (mean-imputed feature insertion) of the
    # reference module is not implemented; all DU lengths are assumed >= 1.
    # F.dropout(p=0.3) is an identity in inference mode and is therefore omitted.
    return out[:N]


def init_params(key, E, H):
    """Deterministic init matching PyTorch parameter shapes (uniform(-1/sqrt(H), 1/sqrt(H)))."""
    k = 1.0 / np.sqrt(H)
    keys = jax.random.split(key, 14)

    def u(kk, shape):
        return jax.random.uniform(kk, shape, jnp.float32, -k, k)

    w_ih_f = u(keys[0], (4 * H, E));      w_hh_f = u(keys[1], (4 * H, H))
    b_ih_f = u(keys[2], (4 * H,));        b_hh_f = u(keys[3], (4 * H,))
    w_ih_b = u(keys[4], (4 * H, E));      w_hh_b = u(keys[5], (4 * H, H))
    b_ih_b = u(keys[6], (4 * H,));        b_hh_b = u(keys[7], (4 * H,))
    w_ih_c = u(keys[8], (4 * H, 2 * H));  w_hh_c = u(keys[9], (4 * H, H))
    b_ih_c = u(keys[10], (4 * H,));       b_hh_c = u(keys[11], (4 * H,))
    lin_w = u(keys[12], (2, H));          lin_b = u(keys[13], (2,))

    c_wih = w_ih_c.T                      # (2H, 4H), rows: [h_fwd part ; h_bwd part]
    return dict(
        hidden_dim=H,
        du_wih_f=w_ih_f.T, du_whh_f=w_hh_f.T, du_b_f=(b_ih_f + b_hh_f).reshape(1, 4 * H),
        du_wih_b=w_ih_b.T, du_whh_b=w_hh_b.T, du_b_b=(b_ih_b + b_hh_b).reshape(1, 4 * H),
        c_wih=c_wih,                                           # kept for the numpy ref
        c_wih_top=c_wih[:H, :], c_wih_bot=c_wih[H:, :],
        c_whh=w_hh_c.T, c_b=(b_ih_c + b_hh_c).reshape(1, 4 * H),
        lin_w=lin_w.T, lin_b=lin_b.reshape(1, 2),
    )


# ------------------------- pure-numpy reference (for checking) -------------------------
def _ref_forward_np(x, lengths, p, H):
    def sigmoid(z):
        return 1.0 / (1.0 + np.exp(-z))

    def cell(xt, h, c, wih, whh, b):
        gates = xt @ wih + h @ whh + b[0]
        i = sigmoid(gates[0 * H:1 * H]); f = sigmoid(gates[1 * H:2 * H])
        g = np.tanh(gates[2 * H:3 * H]); o = sigmoid(gates[3 * H:4 * H])
        c = f * c + i * g
        h = o * np.tanh(c)
        return h, c

    x = np.asarray(x, np.float32)
    N = x.shape[0]
    feats = []
    for n in range(N):
        L = int(lengths[n])
        h = np.zeros(H, np.float32); c = np.zeros(H, np.float32)
        for t in range(L):
            h, c = cell(x[n, t], h, c, np.asarray(p["du_wih_f"]), np.asarray(p["du_whh_f"]), np.asarray(p["du_b_f"]))
        hf = h
        h = np.zeros(H, np.float32); c = np.zeros(H, np.float32)
        for t in range(L - 1, -1, -1):
            h, c = cell(x[n, t], h, c, np.asarray(p["du_wih_b"]), np.asarray(p["du_whh_b"]), np.asarray(p["du_b_b"]))
        feats.append(np.concatenate([hf, h]))
    feat = np.stack(feats)
    h = np.zeros(H, np.float32); c = np.zeros(H, np.float32)
    outs = []
    for n in range(N):
        h, c = cell(feat[n], h, c, np.asarray(p["c_wih"]), np.asarray(p["c_whh"]), np.asarray(p["c_b"]))
        outs.append(h)
    hs = np.stack(outs)
    logits = hs @ np.asarray(p["lin_w"]) + np.asarray(p["lin_b"])[0]
    m = logits.max(axis=1, keepdims=True)
    lse = m + np.log(np.exp(logits - m).sum(axis=1, keepdims=True))
    return logits - lse


if __name__ == "__main__":
    E, H = 16, 32          # embedding_dim, hidden_dim
    N_du, T = 4, 8         # number of discourse units, max words per DU

    key = jax.random.PRNGKey(0)
    kx, kp = jax.random.split(key)
    x = jax.random.normal(kx, (N_du, T, E), jnp.float32)      # padded word embeddings
    lengths = jnp.array([8, 5, 3, 7], jnp.int32)              # valid words per DU (all >= 1)
    params = init_params(kp, E, H)

    out = bilstm_causal_forward(x, lengths, params)           # f32 matmuls; pass
    out = jax.block_until_ready(out)                          # matmul_dtype=jnp.bfloat16 on v6e/v7x

    ref = _ref_forward_np(np.asarray(x), np.asarray(lengths), params, H)
    np.testing.assert_allclose(np.asarray(out), ref, rtol=5e-2, atol=5e-2)
    print("KERNEL_OK")
</pallas_src>

<mosaic_0001>
module attributes {stable_mosaic.version = 11 : i64} {
  func.func @_fused_kernel(%arg0: memref<64x16xf32, #tpu.memory_space<vmem>>, %arg1: memref<8x1xi32, #tpu.memory_space<vmem>>, %arg2: memref<16x128xf32, #tpu.memory_space<vmem>>, %arg3: memref<32x128xf32, #tpu.memory_space<vmem>>, %arg4: memref<1x128xf32, #tpu.memory_space<vmem>>, %arg5: memref<16x128xf32, #tpu.memory_space<vmem>>, %arg6: memref<32x128xf32, #tpu.memory_space<vmem>>, %arg7: memref<1x128xf32, #tpu.memory_space<vmem>>, %arg8: memref<32x128xf32, #tpu.memory_space<vmem>>, %arg9: memref<32x128xf32, #tpu.memory_space<vmem>>, %arg10: memref<32x128xf32, #tpu.memory_space<vmem>>, %arg11: memref<1x128xf32, #tpu.memory_space<vmem>>, %arg12: memref<32x2xf32, #tpu.memory_space<vmem>>, %arg13: memref<1x2xf32, #tpu.memory_space<vmem>>, %arg14: memref<8x2xf32, #tpu.memory_space<vmem>>, %arg15: memref<64x128xf32, #tpu.memory_space<vmem>>, %arg16: memref<64x128xf32, #tpu.memory_space<vmem>>) attributes {dimension_semantics = [], scalar_prefetch = 0 : i64, scratch_operands = 2 : i64, tpu.core_type = #tpu.core_type<tc>} {
    %c0 = arith.constant 0 : index
    %c0_0 = arith.constant 0 : index
    %0 = vector.load %arg0[%c0, %c0_0] : memref<64x16xf32, #tpu.memory_space<vmem>>, vector<64x16xf32>
    %c0_1 = arith.constant 0 : index
    %c0_2 = arith.constant 0 : index
    %1 = vector.load %arg2[%c0_1, %c0_2] : memref<16x128xf32, #tpu.memory_space<vmem>>, vector<16x128xf32>
    %cst = arith.constant dense<0.000000e+00> : vector<64x128xf32>
    %2 = tpu.matmul %0, %1, %cst {dimension_numbers = #tpu.dot_dimension_numbers<[1], [0], [0], [1], [0, 0, 1, 1], [], []>} : vector<64x16xf32>, vector<16x128xf32>, vector<64x128xf32> -> vector<64x128xf32>
    %c0_3 = arith.constant 0 : index
    %c0_4 = arith.constant 0 : index
    %3 = vector.load %arg4[%c0_3, %c0_4] : memref<1x128xf32, #tpu.memory_space<vmem>>, vector<1x128xf32>
    %4 = vector.broadcast %3 : vector<1x128xf32> to vector<64x128xf32>
    %5 = arith.addf %2, %4 : vector<64x128xf32>
    %c0_5 = arith.constant 0 : index
    %c0_6 = arith.constant 0 : index
    %6 = vector.load %arg15[%c0_5, %c0_6] : memref<64x128xf32, #tpu.memory_space<vmem>>, vector<64x128xf32>
    tpu.vector_store %arg15[%c0_5, %c0_6], %5 {strides = array<i32>} : memref<64x128xf32, #tpu.memory_space<vmem>>, vector<64x128xf32>,
    %c0_7 = arith.constant 0 : index
    %c0_8 = arith.constant 0 : index
    %7 = vector.load %arg5[%c0_7, %c0_8] : memref<16x128xf32, #tpu.memory_space<vmem>>, vector<16x128xf32>
    %cst_9 = arith.constant dense<0.000000e+00> : vector<64x128xf32>
    %8 = tpu.matmul %0, %7, %cst_9 {dimension_numbers = #tpu.dot_dimension_numbers<[1], [0], [0], [1], [0, 0, 1, 1], [], []>} : vector<64x16xf32>, vector<16x128xf32>, vector<64x128xf32> -> vector<64x128xf32>
    %c0_10 = arith.constant 0 : index
    %c0_11 = arith.constant 0 : index
    %9 = vector.load %arg7[%c0_10, %c0_11] : memref<1x128xf32, #tpu.memory_space<vmem>>, vector<1x128xf32>
    %10 = vector.broadcast %9 : vector<1x128xf32> to vector<64x128xf32>
    %11 = arith.addf %8, %10 : vector<64x128xf32>
    %c0_12 = arith.constant 0 : index
    %c0_13 = arith.constant 0 : index
    %12 = vector.load %arg16[%c0_12, %c0_13] : memref<64x128xf32, #tpu.memory_space<vmem>>, vector<64x128xf32>
    tpu.vector_store %arg16[%c0_12, %c0_13], %11 {strides = array<i32>} : memref<64x128xf32, #tpu.memory_space<vmem>>, vector<64x128xf32>,
    %c0_14 = arith.constant 0 : index
    %c0_15 = arith.constant 0 : index
    %13 = vector.load %arg1[%c0_14, %c0_15] : memref<8x1xi32, #tpu.memory_space<vmem>>, vector<8x1xi32>
    %c0_16 = arith.constant 0 : index
    %c0_17 = arith.constant 0 : index
    %14 = vector.load %arg3[%c0_16, %c0_17] : memref<32x128xf32, #tpu.memory_space<vmem>>, vector<32x128xf32>
    %c0_18 = arith.constant 0 : index
    %c0_19 = arith.constant 0 : index
    %15 = vector.load %arg6[%c0_18, %c0_19] : memref<32x128xf32, #tpu.memory_space<vmem>>, vector<32x128xf32>
    %cst_20 = arith.constant 0.000000e+00 : f32
    %16 = vector.broadcast %cst_20 : f32 to vector<8x32xf32>
    %c0_i32 = arith.constant 0 : i32
    %c8_i32 = arith.constant 8 : i32
    %17 = arith.muli %c0_i32, %c8_i32 : i32
    %18 = arith.index_cast %17 : i32 to index
    %c0_21 = arith.constant 0 : index
    %19 = vector.load %arg15[%18, %c0_21] : memref<64x128xf32, #tpu.memory_space<vmem>>, vector<8x128xf32>
    %cst_22 = arith.constant dense<0.000000e+00> : vector<8x128xf32>
    %20 = tpu.matmul %16, %14, %cst_22 {dimension_numbers = #tpu.dot_dimension_numbers<[1], [0], [0], [1], [0, 0, 1, 1], [], []>} : vector<8x32xf32>, vector<32x128xf32>, vector<8x128xf32> -> vector<8x128xf32>
    %21 = arith.addf %19, %20 : vector<8x128xf32>
    %22 = arith.negf %21 : vector<8x128xf32>
    %23 = math.exp %22 : vector<8x128xf32>
    %cst_23 = arith.constant 1.000000e+00 : f32
    %24 = vector.broadcast %cst_23 : f32 to vector<8x128xf32>
    %25 = arith.addf %24, %23 : vector<8x128xf32>
    %26 = arith.divf %24, %25 : vector<8x128xf32>
    %27 = math.tanh %21 : vector<8x128xf32>
    %28 = vector.extract_strided_slice %26 {offsets = [0, 0], sizes = [8, 32], strides = [1, 1]} : vector<8x128xf32> to vector<8x32xf32>
    %29 = vector.extract_strided_slice %26 {offsets = [0, 32], sizes = [8, 32], strides = [1, 1]} : vector<8x128xf32> to vector<8x32xf32>
    %30 = vector.extract_strided_slice %27 {offsets = [0, 64], sizes = [8, 32], strides = [1, 1]} : vector<8x128xf32> to vector<8x32xf32>
    %31 = vector.extract_strided_slice %26 {offsets = [0, 96], sizes = [8, 32], strides = [1, 1]} : vector<8x128xf32> to vector<8x32xf32>
    %32 = arith.mulf %29, %16 : vector<8x32xf32>
    %33 = arith.mulf %28, %30 : vector<8x32xf32>
    %34 = arith.addf %32, %33 : vector<8x32xf32>
    %35 = math.tanh %34 : vector<8x32xf32>
    %36 = arith.mulf %31, %35 : vector<8x32xf32>
    %37 = vector.broadcast %c0_i32 : i32 to vector<8x1xi32>
    %38 = arith.cmpi sgt, %13, %37 : vector<8x1xi32>
    %39 = vector.shape_cast %38 : vector<8x1xi1> to vector<8x1xi1>
    %40 = vector.broadcast %39 : vector<8x1xi1> to vector<8x32xi1>
    %41 = arith.select %40, %36, %16 : vector<8x32xi1>, vector<8x32xf32>
    %42 = vector.shape_cast %38 : vector<8x1xi1> to vector<8x1xi1>
    %43 = vector.broadcast %42 : vector<8x1xi1> to vector<8x32xi1>
    %44 = arith.select %43, %34, %16 : vector<8x32xi1>, vector<8x32xf32>
    %c7_i32 = arith.constant 7 : i32
    %45 = arith.subi %c7_i32, %c0_i32 : i32
    %c8_i32_24 = arith.constant 8 : i32
    %46 = arith.muli %45, %c8_i32_24 : i32
    %47 = arith.index_cast %46 : i32 to index
    %c0_25 = arith.constant 0 : index
    %48 = vector.load %arg16[%47, %c0_25] : memref<64x128xf32, #tpu.memory_space<vmem>>, vector<8x128xf32>
    %cst_26 = arith.constant dense<0.000000e+00> : vector<8x128xf32>
    %49 = tpu.matmul %16, %15, %cst_26 {dimension_numbers = #tpu.dot_dimension_numbers<[1], [0], [0], [1], [0, 0, 1, 1], [], []>} : vector<8x32xf32>, vector<32x128xf32>, vector<8x128xf32> -> vector<8x128xf32>
    %50 = arith.addf %48, %49 : vector<8x128xf32>
    %51 = arith.negf %50 : vector<8x128xf32>
    %52 = math.exp %51 : vector<8x128xf32>
    %cst_27 = arith.constant 1.000000e+00 : f32
    %53 = vector.broadcast %cst_27 : f32 to vector<8x128xf32>
    %54 = arith.addf %53, %52 : vector<8x128xf32>
    %55 = arith.divf %53, %54 : vector<8x128xf32>
    %56 = math.tanh %50 : vector<8x128xf32>
    %57 = vector.extract_strided_slice %55 {offsets = [0, 0], sizes = [8, 32], strides = [1, 1]} : vector<8x128xf32> to vector<8x32xf32>
    %58 = vector.extract_strided_slice %55 {offsets = [0, 32], sizes = [8, 32], strides = [1, 1]} : vector<8x128xf32> to vector<8x32xf32>
    %59 = vector.extract_strided_slice %56 {offsets = [0, 64], sizes = [8, 32], strides = [1, 1]} : vector<8x128xf32> to vector<8x32xf32>
    %60 = vector.extract_strided_slice %55 {offsets = [0, 96], sizes = [8, 32], strides = [1, 1]} : vector<8x128xf32> to vector<8x32xf32>
    %61 = arith.mulf %58, %16 : vector<8x32xf32>
    %62 = arith.mulf %57, %59 : vector<8x32xf32>
    %63 = arith.addf %61, %62 : vector<8x32xf32>
    %64 = math.tanh %63 : vector<8x32xf32>
    %65 = arith.mulf %60, %64 : vector<8x32xf32>
    %66 = vector.broadcast %45 : i32 to vector<8x1xi32>
    %67 = arith.cmpi sgt, %13, %66 : vector<8x1xi32>
    %68 = vector.shape_cast %67 : vector<8x1xi1> to vector<8x1xi1>
    %69 = vector.broadcast %68 : vector<8x1xi1> to vector<8x32xi1>
    %70 = arith.select %69, %65, %16 : vector<8x32xi1>, vector<8x32xf32>
    %71 = vector.shape_cast %67 : vector<8x1xi1> to vector<8x1xi1>
    %72 = vector.broadcast %71 : vector<8x1xi1> to vector<8x32xi1>
    %73 = arith.select %72, %63, %16 : vector<8x32xi1>, vector<8x32xf32>
    %c1_i32 = arith.constant 1 : i32
    %c8_i32_28 = arith.constant 8 : i32
    %74 = arith.muli %c1_i32, %c8_i32_28 : i32
    %75 = arith.index_cast %74 : i32 to index
    %c0_29 = arith.constant 0 : index
    %76 = vector.load %arg15[%75, %c0_29] : memref<64x128xf32, #tpu.memory_space<vmem>>, vector<8x128xf32>
    %cst_30 = arith.constant dense<0.000000e+00> : vector<8x128xf32>
    %77 = tpu.matmul %41, %14, %cst_30 {dimension_numbers = #tpu.dot_dimension_numbers<[1], [0], [0], [1], [0, 0, 1, 1], [], []>} : vector<8x32xf32>, vector<32x128xf32>, vector<8x128xf32> -> vector<8x128xf32>
    %78 = arith.addf %76, %77 : vector<8x128xf32>
    %79 = arith.negf %78 : vector<8x128xf32>
    %80 = math.exp %79 : vector<8x128xf32>
    %cst_31 = arith.constant 1.000000e+00 : f32
    %81 = vector.broadcast %cst_31 : f32 to vector<8x128xf32>
    %82 = arith.addf %81, %80 : vector<8x128xf32>
    %83 = arith.divf %81, %82 : vector<8x128xf32>
    %84 = math.tanh %78 : vector<8x128xf32>
    %85 = vector.extract_strided_slice %83 {offsets = [0, 0], sizes = [8, 32], strides = [1, 1]} : vector<8x128xf32> to vector<8x32xf32>
    %86 = vector.extract_strided_slice %83 {offsets = [0, 32], sizes = [8, 32], strides = [1, 1]} : vector<8x128xf32> to vector<8x32xf32>
    %87 = vector.extract_strided_slice %84 {offsets = [0, 64], sizes = [8, 32], strides = [1, 1]} : vector<8x128xf32> to vector<8x32xf32>
    %88 = vector.extract_strided_slice %83 {offsets = [0, 96], sizes = [8, 32], strides = [1, 1]} : vector<8x128xf32> to vector<8x32xf32>
    %89 = arith.mulf %86, %44 : vector<8x32xf32>
    %90 = arith.mulf %85, %87 : vector<8x32xf32>
    %91 = arith.addf %89, %90 : vector<8x32xf32>
    %92 = math.tanh %91 : vector<8x32xf32>
    %93 = arith.mulf %88, %92 : vector<8x32xf32>
    %94 = vector.broadcast %c1_i32 : i32 to vector<8x1xi32>
    %95 = arith.cmpi sgt, %13, %94 : vector<8x1xi32>
    %96 = vector.shape_cast %95 : vector<8x1xi1> to vector<8x1xi1>
    %97 = vector.broadcast %96 : vector<8x1xi1> to vector<8x32xi1>
    %98 = arith.select %97, %93, %41 : vector<8x32xi1>, vector<8x32xf32>
    %99 = vector.shape_cast %95 : vector<8x1xi1> to vector<8x1xi1>
    %100 = vector.broadcast %99 : vector<8x1xi1> to vector<8x32xi1>
    %101 = arith.select %100, %91, %44 : vector<8x32xi1>, vector<8x32xf32>
    %c7_i32_32 = arith.constant 7 : i32
    %102 = arith.subi %c7_i32_32, %c1_i32 : i32
    %c8_i32_33 = arith.constant 8 : i32
    %103 = arith.muli %102, %c8_i32_33 : i32
    %104 = arith.index_cast %103 : i32 to index
    %c0_34 = arith.constant 0 : index
    %105 = vector.load %arg16[%104, %c0_34] : memref<64x128xf32, #tpu.memory_space<vmem>>, vector<8x128xf32>
    %cst_35 = arith.constant dense<0.000000e+00> : vector<8x128xf32>
    %106 = tpu.matmul %70, %15, %cst_35 {dimension_numbers = #tpu.dot_dimension_numbers<[1], [0], [0], [1], [0, 0, 1, 1], [], []>} : vector<8x32xf32>, vector<32x128xf32>, vector<8x128xf32> -> vector<8x128xf32>
    %107 = arith.addf %105, %106 : vector<8x128xf32>
    %108 = arith.negf %107 : vector<8x128xf32>
    %109 = math.exp %108 : vector<8x128xf32>
    %cst_36 = arith.constant 1.000000e+00 : f32
    %110 = vector.broadcast %cst_36 : f32 to vector<8x128xf32>
    %111 = arith.addf %110, %109 : vector<8x128xf32>
    %112 = arith.divf %110, %111 : vector<8x128xf32>
    %113 = math.tanh %107 : vector<8x128xf32>
    %114 = vector.extract_strided_slice %112 {offsets = [0, 0], sizes = [8, 32], strides = [1, 1]} : vector<8x128xf32> to vector<8x32xf32>
    %115 = vector.extract_strided_slice %112 {offsets = [0, 32], sizes = [8, 32], strides = [1, 1]} : vector<8x128xf32> to vector<8x32xf32>
    %116 = vector.extract_strided_slice %113 {offsets = [0, 64], sizes = [8, 32], strides = [1, 1]} : vector<8x128xf32> to vector<8x32xf32>
    %117 = vector.extract_strided_slice %112 {offsets = [0, 96], sizes = [8, 32], strides = [1, 1]} : vector<8x128xf32> to vector<8x32xf32>
    %118 = arith.mulf %115, %73 : vector<8x32xf32>
    %119 = arith.mulf %114, %116 : vector<8x32xf32>
    %120 = arith.addf %118, %119 : vector<8x32xf32>
    %121 = math.tanh %120 : vector<8x32xf32>
    %122 = arith.mulf %117, %121 : vector<8x32xf32>
    %123 = vector.broadcast %102 : i32 to vector<8x1xi32>
    %124 = arith.cmpi sgt, %13, %123 : vector<8x1xi32>
    %125 = vector.shape_cast %124 : vector<8x1xi1> to vector<8x1xi1>
    %126 = vector.broadcast %125 : vector<8x1xi1> to vector<8x32xi1>
    %127 = arith.select %126, %122, %70 : vector<8x32xi1>, vector<8x32xf32>
    %128 = vector.shape_cast %124 : vector<8x1xi1> to vector<8x1xi1>
    %129 = vector.broadcast %128 : vector<8x1xi1> to vector<8x32xi1>
    %130 = arith.select %129, %120, %73 : vector<8x32xi1>, vector<8x32xf32>
    %c2_i32 = arith.constant 2 : i32
    %c8_i32_37 = arith.constant 8 : i32
    %131 = arith.muli %c2_i32, %c8_i32_37 : i32
    %132 = arith.index_cast %131 : i32 to index
    %c0_38 = arith.constant 0 : index
    %133 = vector.load %arg15[%132, %c0_38] : memref<64x128xf32, #tpu.memory_space<vmem>>, vector<8x128xf32>
    %cst_39 = arith.constant dense<0.000000e+00> : vector<8x128xf32>
    %134 = tpu.matmul %98, %14, %cst_39 {dimension_numbers = #tpu.dot_dimension_numbers<[1], [0], [0], [1], [0, 0, 1, 1], [], []>} : vector<8x32xf32>, vector<32x128xf32>, vector<8x128xf32> -> vector<8x128xf32>
    %135 = arith.addf %133, %134 : vector<8x128xf32>
    %136 = arith.negf %135 : vector<8x128xf32>
    %137 = math.exp %136 : vector<8x128xf32>
    %cst_40 = arith.constant 1.000000e+00 : f32
    %138 = vector.broadcast %cst_40 : f32 to vector<8x128xf32>
    %139 = arith.addf %138, %137 : vector<8x128xf32>
    %140 = arith.divf %138, %139 : vector<8x128xf32>
    %141 = math.tanh %135 : vector<8x128xf32>
    %142 = vector.extract_strided_slice %140 {offsets = [0, 0], sizes = [8, 32], strides = [1, 1]} : vector<8x128xf32> to vector<8x32xf32>
    %143 = vector.extract_strided_slice %140 {offsets = [0, 32], sizes = [8, 32], strides = [1, 1]} : vector<8x128xf32> to vector<8x32xf32>
    %144 = vector.extract_strided_slice %141 {offsets = [0, 64], sizes = [8, 32], strides = [1, 1]} : vector<8x128xf32> to vector<8x32xf32>
    %145 = vector.extract_strided_slice %140 {offsets = [0, 96], sizes = [8, 32], strides = [1, 1]} : vector<8x128xf32> to vector<8x32xf32>
    %146 = arith.mulf %143, %101 : vector<8x32xf32>
    %147 = arith.mulf %142, %144 : vector<8x32xf32>
    %148 = arith.addf %146, %147 : vector<8x32xf32>
    %149 = math.tanh %148 : vector<8x32xf32>
    %150 = arith.mulf %145, %149 : vector<8x32xf32>
    %151 = vector.broadcast %c2_i32 : i32 to vector<8x1xi32>
    %152 = arith.cmpi sgt, %13, %151 : vector<8x1xi32>
    %153 = vector.shape_cast %152 : vector<8x1xi1> to vector<8x1xi1>
    %154 = vector.broadcast %153 : vector<8x1xi1> to vector<8x32xi1>
    %155 = arith.select %154, %150, %98 : vector<8x32xi1>, vector<8x32xf32>
    %156 = vector.shape_cast %152 : vector<8x1xi1> to vector<8x1xi1>
    %157 = vector.broadcast %156 : vector<8x1xi1> to vector<8x32xi1>
    %158 = arith.select %157, %148, %101 : vector<8x32xi1>, vector<8x32xf32>
    %c7_i32_41 = arith.constant 7 : i32
    %159 = arith.subi %c7_i32_41, %c2_i32 : i32
    %c8_i32_42 = arith.constant 8 : i32
    %160 = arith.muli %159, %c8_i32_42 : i32
    %161 = arith.index_cast %160 : i32 to index
    %c0_43 = arith.constant 0 : index
    %162 = vector.load %arg16[%161, %c0_43] : memref<64x128xf32, #tpu.memory_space<vmem>>, vector<8x128xf32>
    %cst_44 = arith.constant dense<0.000000e+00> : vector<8x128xf32>
    %163 = tpu.matmul %127, %15, %cst_44 {dimension_numbers = #tpu.dot_dimension_numbers<[1], [0], [0], [1], [0, 0, 1, 1], [], []>} : vector<8x32xf32>, vector<32x128xf32>, vector<8x128xf32> -> vector<8x128xf32>
    %164 = arith.addf %162, %163 : vector<8x128xf32>
    %165 = arith.negf %164 : vector<8x128xf32>
    %166 = math.exp %165 : vector<8x128xf32>
    %cst_45 = arith.constant 1.000000e+00 : f32
    %167 = vector.broadcast %cst_45 : f32 to vector<8x128xf32>
    %168 = arith.addf %167, %166 : vector<8x128xf32>
    %169 = arith.divf %167, %168 : vector<8x128xf32>
    %170 = math.tanh %164 : vector<8x128xf32>
    %171 = vector.extract_strided_slice %169 {offsets = [0, 0], sizes = [8, 32], strides = [1, 1]} : vector<8x128xf32> to vector<8x32xf32>
    %172 = vector.extract_strided_slice %169 {offsets = [0, 32], sizes = [8, 32], strides = [1, 1]} : vector<8x128xf32> to vector<8x32xf32>
    %173 = vector.extract_strided_slice %170 {offsets = [0, 64], sizes = [8, 32], strides = [1, 1]} : vector<8x128xf32> to vector<8x32xf32>
    %174 = vector.extract_strided_slice %169 {offsets = [0, 96], sizes = [8, 32], strides = [1, 1]} : vector<8x128xf32> to vector<8x32xf32>
    %175 = arith.mulf %172, %130 : vector<8x32xf32>
    %176 = arith.mulf %171, %173 : vector<8x32xf32>
    %177 = arith.addf %175, %176 : vector<8x32xf32>
    %178 = math.tanh %177 : vector<8x32xf32>
    %179 = arith.mulf %174, %178 : vector<8x32xf32>
    %180 = vector.broadcast %159 : i32 to vector<8x1xi32>
    %181 = arith.cmpi sgt, %13, %180 : vector<8x1xi32>
    %182 = vector.shape_cast %181 : vector<8x1xi1> to vector<8x1xi1>
    %183 = vector.broadcast %182 : vector<8x1xi1> to vector<8x32xi1>
    %184 = arith.select %183, %179, %127 : vector<8x32xi1>, vector<8x32xf32>
    %185 = vector.shape_cast %181 : vector<8x1xi1> to vector<8x1xi1>
    %186 = vector.broadcast %185 : vector<8x1xi1> to vector<8x32xi1>
    %187 = arith.select %186, %177, %130 : vector<8x32xi1>, vector<8x32xf32>
    %c3_i32 = arith.constant 3 : i32
    %c8_i32_46 = arith.constant 8 : i32
    %188 = arith.muli %c3_i32, %c8_i32_46 : i32
    %189 = arith.index_cast %188 : i32 to index
    %c0_47 = arith.constant 0 : index
    %190 = vector.load %arg15[%189, %c0_47] : memref<64x128xf32, #tpu.memory_space<vmem>>, vector<8x128xf32>
    %cst_48 = arith.constant dense<0.000000e+00> : vector<8x128xf32>
    %191 = tpu.matmul %155, %14, %cst_48 {dimension_numbers = #tpu.dot_dimension_numbers<[1], [0], [0], [1], [0, 0, 1, 1], [], []>} : vector<8x32xf32>, vector<32x128xf32>, vector<8x128xf32> -> vector<8x128xf32>
    %192 = arith.addf %190, %191 : vector<8x128xf32>
    %193 = arith.negf %192 : vector<8x128xf32>
    %194 = math.exp %193 : vector<8x128xf32>
    %cst_49 = arith.constant 1.000000e+00 : f32
    %195 = vector.broadcast %cst_49 : f32 to vector<8x128xf32>
    %196 = arith.addf %195, %194 : vector<8x128xf32>
    %197 = arith.divf %195, %196 : vector<8x128xf32>
    %198 = math.tanh %192 : vector<8x128xf32>
    %199 = vector.extract_strided_slice %197 {offsets = [0, 0], sizes = [8, 32], strides = [1, 1]} : vector<8x128xf32> to vector<8x32xf32>
    %200 = vector.extract_strided_slice %197 {offsets = [0, 32], sizes = [8, 32], strides = [1, 1]} : vector<8x128xf32> to vector<8x32xf32>
    %201 = vector.extract_strided_slice %198 {offsets = [0, 64], sizes = [8, 32], strides = [1, 1]} : vector<8x128xf32> to vector<8x32xf32>
    %202 = vector.extract_strided_slice %197 {offsets = [0, 96], sizes = [8, 32], strides = [1, 1]} : vector<8x128xf32> to vector<8x32xf32>
    %203 = arith.mulf %200, %158 : vector<8x32xf32>
    %204 = arith.mulf %199, %201 : vector<8x32xf32>
    %205 = arith.addf %203, %204 : vector<8x32xf32>
    %206 = math.tanh %205 : vector<8x32xf32>
    %207 = arith.mulf %202, %206 : vector<8x32xf32>
    %208 = vector.broadcast %c3_i32 : i32 to vector<8x1xi32>
    %209 = arith.cmpi sgt, %13, %208 : vector<8x1xi32>
    %210 = vector.shape_cast %209 : vector<8x1xi1> to vector<8x1xi1>
    %211 = vector.broadcast %210 : vector<8x1xi1> to vector<8x32xi1>
    %212 = arith.select %211, %207, %155 : vector<8x32xi1>, vector<8x32xf32>
    %213 = vector.shape_cast %209 : vector<8x1xi1> to vector<8x1xi1>
    %214 = vector.broadcast %213 : vector<8x1xi1> to vector<8x32xi1>
    %215 = arith.select %214, %205, %158 : vector<8x32xi1>, vector<8x32xf32>
    %c7_i32_50 = arith.constant 7 : i32
    %216 = arith.subi %c7_i32_50, %c3_i32 : i32
    %c8_i32_51 = arith.constant 8 : i32
    %217 = arith.muli %216, %c8_i32_51 : i32
    %218 = arith.index_cast %217 : i32 to index
    %c0_52 = arith.constant 0 : index
    %219 = vector.load %arg16[%218, %c0_52] : memref<64x128xf32, #tpu.memory_space<vmem>>, vector<8x128xf32>
    %cst_53 = arith.constant dense<0.000000e+00> : vector<8x128xf32>
    %220 = tpu.matmul %184, %15, %cst_53 {dimension_numbers = #tpu.dot_dimension_numbers<[1], [0], [0], [1], [0, 0, 1, 1], [], []>} : vector<8x32xf32>, vector<32x128xf32>, vector<8x128xf32> -> vector<8x128xf32>
    %221 = arith.addf %219, %220 : vector<8x128xf32>
    %222 = arith.negf %221 : vector<8x128xf32>
    %223 = math.exp %222 : vector<8x128xf32>
    %cst_54 = arith.constant 1.000000e+00 : f32
    %224 = vector.broadcast %cst_54 : f32 to vector<8x128xf32>
    %225 = arith.addf %224, %223 : vector<8x128xf32>
    %226 = arith.divf %224, %225 : vector<8x128xf32>
    %227 = math.tanh %221 : vector<8x128xf32>
    %228 = vector.extract_strided_slice %226 {offsets = [0, 0], sizes = [8, 32], strides = [1, 1]} : vector<8x128xf32> to vector<8x32xf32>
    %229 = vector.extract_strided_slice %226 {offsets = [0, 32], sizes = [8, 32], strides = [1, 1]} : vector<8x128xf32> to vector<8x32xf32>
    %230 = vector.extract_strided_slice %227 {offsets = [0, 64], sizes = [8, 32], strides = [1, 1]} : vector<8x128xf32> to vector<8x32xf32>
    %231 = vector.extract_strided_slice %226 {offsets = [0, 96], sizes = [8, 32], strides = [1, 1]} : vector<8x128xf32> to vector<8x32xf32>
    %232 = arith.mulf %229, %187 : vector<8x32xf32>
    %233 = arith.mulf %228, %230 : vector<8x32xf32>
    %234 = arith.addf %232, %233 : vector<8x32xf32>
    %235 = math.tanh %234 : vector<8x32xf32>
    %236 = arith.mulf %231, %235 : vector<8x32xf32>
    %237 = vector.broadcast %216 : i32 to vector<8x1xi32>
    %238 = arith.cmpi sgt, %13, %237 : vector<8x1xi32>
    %239 = vector.shape_cast %238 : vector<8x1xi1> to vector<8x1xi1>
    %240 = vector.broadcast %239 : vector<8x1xi1> to vector<8x32xi1>
    %241 = arith.select %240, %236, %184 : vector<8x32xi1>, vector<8x32xf32>
    %242 = vector.shape_cast %238 : vector<8x1xi1> to vector<8x1xi1>
    %243 = vector.broadcast %242 : vector<8x1xi1> to vector<8x32xi1>
    %244 = arith.select %243, %234, %187 : vector<8x32xi1>, vector<8x32xf32>
    %c4_i32 = arith.constant 4 : i32
    %c8_i32_55 = arith.constant 8 : i32
    %245 = arith.muli %c4_i32, %c8_i32_55 : i32
    %246 = arith.index_cast %245 : i32 to index
    %c0_56 = arith.constant 0 : index
    %247 = vector.load %arg15[%246, %c0_56] : memref<64x128xf32, #tpu.memory_space<vmem>>, vector<8x128xf32>
    %cst_57 = arith.constant dense<0.000000e+00> : vector<8x128xf32>
    %248 = tpu.matmul %212, %14, %cst_57 {dimension_numbers = #tpu.dot_dimension_numbers<[1], [0], [0], [1], [0, 0, 1, 1], [], []>} : vector<8x32xf32>, vector<32x128xf32>, vector<8x128xf32> -> vector<8x128xf32>
    %249 = arith.addf %247, %248 : vector<8x128xf32>
    %250 = arith.negf %249 : vector<8x128xf32>
    %251 = math.exp %250 : vector<8x128xf32>
    %cst_58 = arith.constant 1.000000e+00 : f32
    %252 = vector.broadcast %cst_58 : f32 to vector<8x128xf32>
    %253 = arith.addf %252, %251 : vector<8x128xf32>
    %254 = arith.divf %252, %253 : vector<8x128xf32>
    %255 = math.tanh %249 : vector<8x128xf32>
    %256 = vector.extract_strided_slice %254 {offsets = [0, 0], sizes = [8, 32], strides = [1, 1]} : vector<8x128xf32> to vector<8x32xf32>
    %257 = vector.extract_strided_slice %254 {offsets = [0, 32], sizes = [8, 32], strides = [1, 1]} : vector<8x128xf32> to vector<8x32xf32>
    %258 = vector.extract_strided_slice %255 {offsets = [0, 64], sizes = [8, 32], strides = [1, 1]} : vector<8x128xf32> to vector<8x32xf32>
    %259 = vector.extract_strided_slice %254 {offsets = [0, 96], sizes = [8, 32], strides = [1, 1]} : vector<8x128xf32> to vector<8x32xf32>
    %260 = arith.mulf %257, %215 : vector<8x32xf32>
    %261 = arith.mulf %256, %258 : vector<8x32xf32>
    %262 = arith.addf %260, %261 : vector<8x32xf32>
    %263 = math.tanh %262 : vector<8x32xf32>
    %264 = arith.mulf %259, %263 : vector<8x32xf32>
    %265 = vector.broadcast %c4_i32 : i32 to vector<8x1xi32>
    %266 = arith.cmpi sgt, %13, %265 : vector<8x1xi32>
    %267 = vector.shape_cast %266 : vector<8x1xi1> to vector<8x1xi1>
    %268 = vector.broadcast %267 : vector<8x1xi1> to vector<8x32xi1>
    %269 = arith.select %268, %264, %212 : vector<8x32xi1>, vector<8x32xf32>
    %270 = vector.shape_cast %266 : vector<8x1xi1> to vector<8x1xi1>
    %271 = vector.broadcast %270 : vector<8x1xi1> to vector<8x32xi1>
    %272 = arith.select %271, %262, %215 : vector<8x32xi1>, vector<8x32xf32>
    %c7_i32_59 = arith.constant 7 : i32
    %273 = arith.subi %c7_i32_59, %c4_i32 : i32
    %c8_i32_60 = arith.constant 8 : i32
    %274 = arith.muli %273, %c8_i32_60 : i32
    %275 = arith.index_cast %274 : i32 to index
    %c0_61 = arith.constant 0 : index
    %276 = vector.load %arg16[%275, %c0_61] : memref<64x128xf32, #tpu.memory_space<vmem>>, vector<8x128xf32>
    %cst_62 = arith.constant dense<0.000000e+00> : vector<8x128xf32>
    %277 = tpu.matmul %241, %15, %cst_62 {dimension_numbers = #tpu.dot_dimension_numbers<[1], [0], [0], [1], [0, 0, 1, 1], [], []>} : vector<8x32xf32>, vector<32x128xf32>, vector<8x128xf32> -> vector<8x128xf32>
    %278 = arith.addf %276, %277 : vector<8x128xf32>
    %279 = arith.negf %278 : vector<8x128xf32>
    %280 = math.exp %279 : vector<8x128xf32>
    %cst_63 = arith.constant 1.000000e+00 : f32
    %281 = vector.broadcast %cst_63 : f32 to vector<8x128xf32>
    %282 = arith.addf %281, %280 : vector<8x128xf32>
    %283 = arith.divf %281, %282 : vector<8x128xf32>
    %284 = math.tanh %278 : vector<8x128xf32>
    %285 = vector.extract_strided_slice %283 {offsets = [0, 0], sizes = [8, 32], strides = [1, 1]} : vector<8x128xf32> to vector<8x32xf32>
    %286 = vector.extract_strided_slice %283 {offsets = [0, 32], sizes = [8, 32], strides = [1, 1]} : vector<8x128xf32> to vector<8x32xf32>
    %287 = vector.extract_strided_slice %284 {offsets = [0, 64], sizes = [8, 32], strides = [1, 1]} : vector<8x128xf32> to vector<8x32xf32>
    %288 = vector.extract_strided_slice %283 {offsets = [0, 96], sizes = [8, 32], strides = [1, 1]} : vector<8x128xf32> to vector<8x32xf32>
    %289 = arith.mulf %286, %244 : vector<8x32xf32>
    %290 = arith.mulf %285, %287 : vector<8x32xf32>
    %291 = arith.addf %289, %290 : vector<8x32xf32>
    %292 = math.tanh %291 : vector<8x32xf32>
    %293 = arith.mulf %288, %292 : vector<8x32xf32>
    %294 = vector.broadcast %273 : i32 to vector<8x1xi32>
    %295 = arith.cmpi sgt, %13, %294 : vector<8x1xi32>
    %296 = vector.shape_cast %295 : vector<8x1xi1> to vector<8x1xi1>
    %297 = vector.broadcast %296 : vector<8x1xi1> to vector<8x32xi1>
    %298 = arith.select %297, %293, %241 : vector<8x32xi1>, vector<8x32xf32>
    %299 = vector.shape_cast %295 : vector<8x1xi1> to vector<8x1xi1>
    %300 = vector.broadcast %299 : vector<8x1xi1> to vector<8x32xi1>
    %301 = arith.select %300, %291, %244 : vector<8x32xi1>, vector<8x32xf32>
    %c5_i32 = arith.constant 5 : i32
    %c8_i32_64 = arith.constant 8 : i32
    %302 = arith.muli %c5_i32, %c8_i32_64 : i32
    %303 = arith.index_cast %302 : i32 to index
    %c0_65 = arith.constant 0 : index
    %304 = vector.load %arg15[%303, %c0_65] : memref<64x128xf32, #tpu.memory_space<vmem>>, vector<8x128xf32>
    %cst_66 = arith.constant dense<0.000000e+00> : vector<8x128xf32>
    %305 = tpu.matmul %269, %14, %cst_66 {dimension_numbers = #tpu.dot_dimension_numbers<[1], [0], [0], [1], [0, 0, 1, 1], [], []>} : vector<8x32xf32>, vector<32x128xf32>, vector<8x128xf32> -> vector<8x128xf32>
    %306 = arith.addf %304, %305 : vector<8x128xf32>
    %307 = arith.negf %306 : vector<8x128xf32>
    %308 = math.exp %307 : vector<8x128xf32>
    %cst_67 = arith.constant 1.000000e+00 : f32
    %309 = vector.broadcast %cst_67 : f32 to vector<8x128xf32>
    %310 = arith.addf %309, %308 : vector<8x128xf32>
    %311 = arith.divf %309, %310 : vector<8x128xf32>
    %312 = math.tanh %306 : vector<8x128xf32>
    %313 = vector.extract_strided_slice %311 {offsets = [0, 0], sizes = [8, 32], strides = [1, 1]} : vector<8x128xf32> to vector<8x32xf32>
    %314 = vector.extract_strided_slice %311 {offsets = [0, 32], sizes = [8, 32], strides = [1, 1]} : vector<8x128xf32> to vector<8x32xf32>
    %315 = vector.extract_strided_slice %312 {offsets = [0, 64], sizes = [8, 32], strides = [1, 1]} : vector<8x128xf32> to vector<8x32xf32>
    %316 = vector.extract_strided_slice %311 {offsets = [0, 96], sizes = [8, 32], strides = [1, 1]} : vector<8x128xf32> to vector<8x32xf32>
    %317 = arith.mulf %314, %272 : vector<8x32xf32>
    %318 = arith.mulf %313, %315 : vector<8x32xf32>
    %319 = arith.addf %317, %318 : vector<8x32xf32>
    %320 = math.tanh %319 : vector<8x32xf32>
    %321 = arith.mulf %316, %320 : vector<8x32xf32>
    %322 = vector.broadcast %c5_i32 : i32 to vector<8x1xi32>
    %323 = arith.cmpi sgt, %13, %322 : vector<8x1xi32>
    %324 = vector.shape_cast %323 : vector<8x1xi1> to vector<8x1xi1>
    %325 = vector.broadcast %324 : vector<8x1xi1> to vector<8x32xi1>
    %326 = arith.select %325, %321, %269 : vector<8x32xi1>, vector<8x32xf32>
    %327 = vector.shape_cast %323 : vector<8x1xi1> to vector<8x1xi1>
    %328 = vector.broadcast %327 : vector<8x1xi1> to vector<8x32xi1>
    %329 = arith.select %328, %319, %272 : vector<8x32xi1>, vector<8x32xf32>
    %c7_i32_68 = arith.constant 7 : i32
    %330 = arith.subi %c7_i32_68, %c5_i32 : i32
    %c8_i32_69 = arith.constant 8 : i32
    %331 = arith.muli %330, %c8_i32_69 : i32
    %332 = arith.index_cast %331 : i32 to index
    %c0_70 = arith.constant 0 : index
    %333 = vector.load %arg16[%332, %c0_70] : memref<64x128xf32, #tpu.memory_space<vmem>>, vector<8x128xf32>
    %cst_71 = arith.constant dense<0.000000e+00> : vector<8x128xf32>
    %334 = tpu.matmul %298, %15, %cst_71 {dimension_numbers = #tpu.dot_dimension_numbers<[1], [0], [0], [1], [0, 0, 1, 1], [], []>} : vector<8x32xf32>, vector<32x128xf32>, vector<8x128xf32> -> vector<8x128xf32>
    %335 = arith.addf %333, %334 : vector<8x128xf32>
    %336 = arith.negf %335 : vector<8x128xf32>
    %337 = math.exp %336 : vector<8x128xf32>
    %cst_72 = arith.constant 1.000000e+00 : f32
    %338 = vector.broadcast %cst_72 : f32 to vector<8x128xf32>
    %339 = arith.addf %338, %337 : vector<8x128xf32>
    %340 = arith.divf %338, %339 : vector<8x128xf32>
    %341 = math.tanh %335 : vector<8x128xf32>
    %342 = vector.extract_strided_slice %340 {offsets = [0, 0], sizes = [8, 32], strides = [1, 1]} : vector<8x128xf32> to vector<8x32xf32>
    %343 = vector.extract_strided_slice %340 {offsets = [0, 32], sizes = [8, 32], strides = [1, 1]} : vector<8x128xf32> to vector<8x32xf32>
    %344 = vector.extract_strided_slice %341 {offsets = [0, 64], sizes = [8, 32], strides = [1, 1]} : vector<8x128xf32> to vector<8x32xf32>
    %345 = vector.extract_strided_slice %340 {offsets = [0, 96], sizes = [8, 32], strides = [1, 1]} : vector<8x128xf32> to vector<8x32xf32>
    %346 = arith.mulf %343, %301 : vector<8x32xf32>
    %347 = arith.mulf %342, %344 : vector<8x32xf32>
    %348 = arith.addf %346, %347 : vector<8x32xf32>
    %349 = math.tanh %348 : vector<8x32xf32>
    %350 = arith.mulf %345, %349 : vector<8x32xf32>
    %351 = vector.broadcast %330 : i32 to vector<8x1xi32>
    %352 = arith.cmpi sgt, %13, %351 : vector<8x1xi32>
    %353 = vector.shape_cast %352 : vector<8x1xi1> to vector<8x1xi1>
    %354 = vector.broadcast %353 : vector<8x1xi1> to vector<8x32xi1>
    %355 = arith.select %354, %350, %298 : vector<8x32xi1>, vector<8x32xf32>
    %356 = vector.shape_cast %352 : vector<8x1xi1> to vector<8x1xi1>
    %357 = vector.broadcast %356 : vector<8x1xi1> to vector<8x32xi1>
    %358 = arith.select %357, %348, %301 : vector<8x32xi1>, vector<8x32xf32>
    %c6_i32 = arith.constant 6 : i32
    %c8_i32_73 = arith.constant 8 : i32
    %359 = arith.muli %c6_i32, %c8_i32_73 : i32
    %360 = arith.index_cast %359 : i32 to index
    %c0_74 = arith.constant 0 : index
    %361 = vector.load %arg15[%360, %c0_74] : memref<64x128xf32, #tpu.memory_space<vmem>>, vector<8x128xf32>
    %cst_75 = arith.constant dense<0.000000e+00> : vector<8x128xf32>
    %362 = tpu.matmul %326, %14, %cst_75 {dimension_numbers = #tpu.dot_dimension_numbers<[1], [0], [0], [1], [0, 0, 1, 1], [], []>} : vector<8x32xf32>, vector<32x128xf32>, vector<8x128xf32> -> vector<8x128xf32>
    %363 = arith.addf %361, %362 : vector<8x128xf32>
    %364 = arith.negf %363 : vector<8x128xf32>
    %365 = math.exp %364 : vector<8x128xf32>
    %cst_76 = arith.constant 1.000000e+00 : f32
    %366 = vector.broadcast %cst_76 : f32 to vector<8x128xf32>
    %367 = arith.addf %366, %365 : vector<8x128xf32>
    %368 = arith.divf %366, %367 : vector<8x128xf32>
    %369 = math.tanh %363 : vector<8x128xf32>
    %370 = vector.extract_strided_slice %368 {offsets = [0, 0], sizes = [8, 32], strides = [1, 1]} : vector<8x128xf32> to vector<8x32xf32>
    %371 = vector.extract_strided_slice %368 {offsets = [0, 32], sizes = [8, 32], strides = [1, 1]} : vector<8x128xf32> to vector<8x32xf32>
    %372 = vector.extract_strided_slice %369 {offsets = [0, 64], sizes = [8, 32], strides = [1, 1]} : vector<8x128xf32> to vector<8x32xf32>
    %373 = vector.extract_strided_slice %368 {offsets = [0, 96], sizes = [8, 32], strides = [1, 1]} : vector<8x128xf32> to vector<8x32xf32>
    %374 = arith.mulf %371, %329 : vector<8x32xf32>
    %375 = arith.mulf %370, %372 : vector<8x32xf32>
    %376 = arith.addf %374, %375 : vector<8x32xf32>
    %377 = math.tanh %376 : vector<8x32xf32>
    %378 = arith.mulf %373, %377 : vector<8x32xf32>
    %379 = vector.broadcast %c6_i32 : i32 to vector<8x1xi32>
    %380 = arith.cmpi sgt, %13, %379 : vector<8x1xi32>
    %381 = vector.shape_cast %380 : vector<8x1xi1> to vector<8x1xi1>
    %382 = vector.broadcast %381 : vector<8x1xi1> to vector<8x32xi1>
    %383 = arith.select %382, %378, %326 : vector<8x32xi1>, vector<8x32xf32>
    %384 = vector.shape_cast %380 : vector<8x1xi1> to vector<8x1xi1>
    %385 = vector.broadcast %384 : vector<8x1xi1> to vector<8x32xi1>
    %386 = arith.select %385, %376, %329 : vector<8x32xi1>, vector<8x32xf32>
    %c7_i32_77 = arith.constant 7 : i32
    %387 = arith.subi %c7_i32_77, %c6_i32 : i32
    %c8_i32_78 = arith.constant 8 : i32
    %388 = arith.muli %387, %c8_i32_78 : i32
    %389 = arith.index_cast %388 : i32 to index
    %c0_79 = arith.constant 0 : index
    %390 = vector.load %arg16[%389, %c0_79] : memref<64x128xf32, #tpu.memory_space<vmem>>, vector<8x128xf32>
    %cst_80 = arith.constant dense<0.000000e+00> : vector<8x128xf32>
    %391 = tpu.matmul %355, %15, %cst_80 {dimension_numbers = #tpu.dot_dimension_numbers<[1], [0], [0], [1], [0, 0, 1, 1], [], []>} : vector<8x32xf32>, vector<32x128xf32>, vector<8x128xf32> -> vector<8x128xf32>
    %392 = arith.addf %390, %391 : vector<8x128xf32>
    %393 = arith.negf %392 : vector<8x128xf32>
    %394 = math.exp %393 : vector<8x128xf32>
    %cst_81 = arith.constant 1.000000e+00 : f32
    %395 = vector.broadcast %cst_81 : f32 to vector<8x128xf32>
    %396 = arith.addf %395, %394 : vector<8x128xf32>
    %397 = arith.divf %395, %396 : vector<8x128xf32>
    %398 = math.tanh %392 : vector<8x128xf32>
    %399 = vector.extract_strided_slice %397 {offsets = [0, 0], sizes = [8, 32], strides = [1, 1]} : vector<8x128xf32> to vector<8x32xf32>
    %400 = vector.extract_strided_slice %397 {offsets = [0, 32], sizes = [8, 32], strides = [1, 1]} : vector<8x128xf32> to vector<8x32xf32>
    %401 = vector.extract_strided_slice %398 {offsets = [0, 64], sizes = [8, 32], strides = [1, 1]} : vector<8x128xf32> to vector<8x32xf32>
    %402 = vector.extract_strided_slice %397 {offsets = [0, 96], sizes = [8, 32], strides = [1, 1]} : vector<8x128xf32> to vector<8x32xf32>
    %403 = arith.mulf %400, %358 : vector<8x32xf32>
    %404 = arith.mulf %399, %401 : vector<8x32xf32>
    %405 = arith.addf %403, %404 : vector<8x32xf32>
    %406 = math.tanh %405 : vector<8x32xf32>
    %407 = arith.mulf %402, %406 : vector<8x32xf32>
    %408 = vector.broadcast %387 : i32 to vector<8x1xi32>
    %409 = arith.cmpi sgt, %13, %408 : vector<8x1xi32>
    %410 = vector.shape_cast %409 : vector<8x1xi1> to vector<8x1xi1>
    %411 = vector.broadcast %410 : vector<8x1xi1> to vector<8x32xi1>
    %412 = arith.select %411, %407, %355 : vector<8x32xi1>, vector<8x32xf32>
    %413 = vector.shape_cast %409 : vector<8x1xi1> to vector<8x1xi1>
    %414 = vector.broadcast %413 : vector<8x1xi1> to vector<8x32xi1>
    %415 = arith.select %414, %405, %358 : vector<8x32xi1>, vector<8x32xf32>
    %c7_i32_82 = arith.constant 7 : i32
    %c8_i32_83 = arith.constant 8 : i32
    %416 = arith.muli %c7_i32_82, %c8_i32_83 : i32
    %417 = arith.index_cast %416 : i32 to index
    %c0_84 = arith.constant 0 : index
    %418 = vector.load %arg15[%417, %c0_84] : memref<64x128xf32, #tpu.memory_space<vmem>>, vector<8x128xf32>
    %cst_85 = arith.constant dense<0.000000e+00> : vector<8x128xf32>
    %419 = tpu.matmul %383, %14, %cst_85 {dimension_numbers = #tpu.dot_dimension_numbers<[1], [0], [0], [1], [0, 0, 1, 1], [], []>} : vector<8x32xf32>, vector<32x128xf32>, vector<8x128xf32> -> vector<8x128xf32>
    %420 = arith.addf %418, %419 : vector<8x128xf32>
    %421 = arith.negf %420 : vector<8x128xf32>
    %422 = math.exp %421 : vector<8x128xf32>
    %cst_86 = arith.constant 1.000000e+00 : f32
    %423 = vector.broadcast %cst_86 : f32 to vector<8x128xf32>
    %424 = arith.addf %423, %422 : vector<8x128xf32>
    %425 = arith.divf %423, %424 : vector<8x128xf32>
    %426 = math.tanh %420 : vector<8x128xf32>
    %427 = vector.extract_strided_slice %425 {offsets = [0, 0], sizes = [8, 32], strides = [1, 1]} : vector<8x128xf32> to vector<8x32xf32>
    %428 = vector.extract_strided_slice %425 {offsets = [0, 32], sizes = [8, 32], strides = [1, 1]} : vector<8x128xf32> to vector<8x32xf32>
    %429 = vector.extract_strided_slice %426 {offsets = [0, 64], sizes = [8, 32], strides = [1, 1]} : vector<8x128xf32> to vector<8x32xf32>
    %430 = vector.extract_strided_slice %425 {offsets = [0, 96], sizes = [8, 32], strides = [1, 1]} : vector<8x128xf32> to vector<8x32xf32>
    %431 = arith.mulf %428, %386 : vector<8x32xf32>
    %432 = arith.mulf %427, %429 : vector<8x32xf32>
    %433 = arith.addf %431, %432 : vector<8x32xf32>
    %434 = math.tanh %433 : vector<8x32xf32>
    %435 = arith.mulf %430, %434 : vector<8x32xf32>
    %436 = vector.broadcast %c7_i32_82 : i32 to vector<8x1xi32>
    %437 = arith.cmpi sgt, %13, %436 : vector<8x1xi32>
    %438 = vector.shape_cast %437 : vector<8x1xi1> to vector<8x1xi1>
    %439 = vector.broadcast %438 : vector<8x1xi1> to vector<8x32xi1>
    %440 = arith.select %439, %435, %383 : vector<8x32xi1>, vector<8x32xf32>
    %441 = vector.shape_cast %437 : vector<8x1xi1> to vector<8x1xi1>
    %442 = vector.broadcast %441 : vector<8x1xi1> to vector<8x32xi1>
    %443 = arith.select %442, %433, %386 : vector<8x32xi1>, vector<8x32xf32>
    %c7_i32_87 = arith.constant 7 : i32
    %444 = arith.subi %c7_i32_87, %c7_i32_82 : i32
    %c8_i32_88 = arith.constant 8 : i32
    %445 = arith.muli %444, %c8_i32_88 : i32
    %446 = arith.index_cast %445 : i32 to index
    %c0_89 = arith.constant 0 : index
    %447 = vector.load %arg16[%446, %c0_89] : memref<64x128xf32, #tpu.memory_space<vmem>>, vector<8x128xf32>
    %cst_90 = arith.constant dense<0.000000e+00> : vector<8x128xf32>
    %448 = tpu.matmul %412, %15, %cst_90 {dimension_numbers = #tpu.dot_dimension_numbers<[1], [0], [0], [1], [0, 0, 1, 1], [], []>} : vector<8x32xf32>, vector<32x128xf32>, vector<8x128xf32> -> vector<8x128xf32>
    %449 = arith.addf %447, %448 : vector<8x128xf32>
    %450 = arith.negf %449 : vector<8x128xf32>
    %451 = math.exp %450 : vector<8x128xf32>
    %cst_91 = arith.constant 1.000000e+00 : f32
    %452 = vector.broadcast %cst_91 : f32 to vector<8x128xf32>
    %453 = arith.addf %452, %451 : vector<8x128xf32>
    %454 = arith.divf %452, %453 : vector<8x128xf32>
    %455 = math.tanh %449 : vector<8x128xf32>
    %456 = vector.extract_strided_slice %454 {offsets = [0, 0], sizes = [8, 32], strides = [1, 1]} : vector<8x128xf32> to vector<8x32xf32>
    %457 = vector.extract_strided_slice %454 {offsets = [0, 32], sizes = [8, 32], strides = [1, 1]} : vector<8x128xf32> to vector<8x32xf32>
    %458 = vector.extract_strided_slice %455 {offsets = [0, 64], sizes = [8, 32], strides = [1, 1]} : vector<8x128xf32> to vector<8x32xf32>
    %459 = vector.extract_strided_slice %454 {offsets = [0, 96], sizes = [8, 32], strides = [1, 1]} : vector<8x128xf32> to vector<8x32xf32>
    %460 = arith.mulf %457, %415 : vector<8x32xf32>
    %461 = arith.mulf %456, %458 : vector<8x32xf32>
    %462 = arith.addf %460, %461 : vector<8x32xf32>
    %463 = math.tanh %462 : vector<8x32xf32>
    %464 = arith.mulf %459, %463 : vector<8x32xf32>
    %465 = vector.broadcast %444 : i32 to vector<8x1xi32>
    %466 = arith.cmpi sgt, %13, %465 : vector<8x1xi32>
    %467 = vector.shape_cast %466 : vector<8x1xi1> to vector<8x1xi1>
    %468 = vector.broadcast %467 : vector<8x1xi1> to vector<8x32xi1>
    %469 = arith.select %468, %464, %412 : vector<8x32xi1>, vector<8x32xf32>
    %470 = vector.shape_cast %466 : vector<8x1xi1> to vector<8x1xi1>
    %471 = vector.broadcast %470 : vector<8x1xi1> to vector<8x32xi1>
    %472 = arith.select %471, %462, %415 : vector<8x32xi1>, vector<8x32xf32>
    %c8_i32_92 = arith.constant 8 : i32
    %c0_93 = arith.constant 0 : index
    %c0_94 = arith.constant 0 : index
    %473 = vector.load %arg8[%c0_93, %c0_94] : memref<32x128xf32, #tpu.memory_space<vmem>>, vector<32x128xf32>
    %cst_95 = arith.constant dense<0.000000e+00> : vector<8x128xf32>
    %474 = tpu.matmul %440, %473, %cst_95 {dimension_numbers = #tpu.dot_dimension_numbers<[1], [0], [0], [1], [0, 0, 1, 1], [], []>} : vector<8x32xf32>, vector<32x128xf32>, vector<8x128xf32> -> vector<8x128xf32>
    %c0_96 = arith.constant 0 : index
    %c0_97 = arith.constant 0 : index
    %475 = vector.load %arg9[%c0_96, %c0_97] : memref<32x128xf32, #tpu.memory_space<vmem>>, vector<32x128xf32>
    %cst_98 = arith.constant dense<0.000000e+00> : vector<8x128xf32>
    %476 = tpu.matmul %469, %475, %cst_98 {dimension_numbers = #tpu.dot_dimension_numbers<[1], [0], [0], [1], [0, 0, 1, 1], [], []>} : vector<8x32xf32>, vector<32x128xf32>, vector<8x128xf32> -> vector<8x128xf32>
    %477 = arith.addf %474, %476 : vector<8x128xf32>
    %c0_99 = arith.constant 0 : index
    %c0_100 = arith.constant 0 : index
    %478 = vector.load %arg11[%c0_99, %c0_100] : memref<1x128xf32, #tpu.memory_space<vmem>>, vector<1x128xf32>
    %479 = vector.broadcast %478 : vector<1x128xf32> to vector<8x128xf32>
    %480 = arith.addf %477, %479 : vector<8x128xf32>
    %c0_101 = arith.constant 0 : index
    %c0_102 = arith.constant 0 : index
    %481 = vector.load %arg10[%c0_101, %c0_102] : memref<32x128xf32, #tpu.memory_space<vmem>>, vector<32x128xf32>
    %482 = tpu.iota {dimensions = array<i32: 0>} : vector<8x1xi32>
    %cst_103 = arith.constant 0.000000e+00 : f32
    %483 = vector.broadcast %cst_103 : f32 to vector<1x32xf32>
    %cst_104 = arith.constant 0.000000e+00 : f32
    %484 = vector.broadcast %cst_104 : f32 to vector<1x32xf32>
    %cst_105 = arith.constant 0.000000e+00 : f32
    %485 = vector.broadcast %cst_105 : f32 to vector<8x32xf32>
    %c0_i32_106 = arith.constant 0 : i32
    %486 = vector.broadcast %c0_i32_106 : i32 to vector<8x1xi32>
    %487 = arith.cmpi eq, %482, %486 : vector<8x1xi32>
    %cst_107 = arith.constant 0.000000e+00 : f32
    %488 = vector.shape_cast %487 : vector<8x1xi1> to vector<8x1xi1>
    %489 = vector.broadcast %488 : vector<8x1xi1> to vector<8x128xi1>
    %490 = vector.broadcast %cst_107 : f32 to vector<8x128xf32>
    %491 = arith.select %489, %480, %490 : vector<8x128xi1>, vector<8x128xf32>
    %cst_108 = arith.constant dense<0.000000e+00> : vector<128xf32>
    %492 = vector.multi_reduction <add>, %491, %cst_108 [0] : vector<8x128xf32> to vector<128xf32>
    %493 = vector.shape_cast %492 : vector<128xf32> to vector<1x128xf32>
    %cst_109 = arith.constant dense<0.000000e+00> : vector<1x128xf32>
    %494 = tpu.matmul %483, %481, %cst_109 {dimension_numbers = #tpu.dot_dimension_numbers<[1], [0], [0], [1], [0, 0, 1, 1], [], []>} : vector<1x32xf32>, vector<32x128xf32>, vector<1x128xf32> -> vector<1x128xf32>
    %495 = arith.addf %493, %494 : vector<1x128xf32>
    %496 = arith.negf %495 : vector<1x128xf32>
    %497 = math.exp %496 : vector<1x128xf32>
    %cst_110 = arith.constant 1.000000e+00 : f32
    %498 = vector.broadcast %cst_110 : f32 to vector<1x128xf32>
    %499 = arith.addf %498, %497 : vector<1x128xf32>
    %500 = arith.divf %498, %499 : vector<1x128xf32>
    %501 = math.tanh %495 : vector<1x128xf32>
    %502 = vector.extract_strided_slice %500 {offsets = [0, 0], sizes = [1, 32], strides = [1, 1]} : vector<1x128xf32> to vector<1x32xf32>
    %503 = vector.extract_strided_slice %500 {offsets = [0, 32], sizes = [1, 32], strides = [1, 1]} : vector<1x128xf32> to vector<1x32xf32>
    %504 = vector.extract_strided_slice %501 {offsets = [0, 64], sizes = [1, 32], strides = [1, 1]} : vector<1x128xf32> to vector<1x32xf32>
    %505 = vector.extract_strided_slice %500 {offsets = [0, 96], sizes = [1, 32], strides = [1, 1]} : vector<1x128xf32> to vector<1x32xf32>
    %506 = arith.mulf %503, %484 : vector<1x32xf32>
    %507 = arith.mulf %502, %504 : vector<1x32xf32>
    %508 = arith.addf %506, %507 : vector<1x32xf32>
    %509 = math.tanh %508 : vector<1x32xf32>
    %510 = arith.mulf %505, %509 : vector<1x32xf32>
    %511 = vector.shape_cast %487 : vector<8x1xi1> to vector<8x1xi1>
    %512 = vector.broadcast %511 : vector<8x1xi1> to vector<8x32xi1>
    %513 = vector.shape_cast %510 : vector<1x32xf32> to vector<1x32xf32>
    %514 = vector.broadcast %513 : vector<1x32xf32> to vector<8x32xf32>
    %515 = arith.select %512, %514, %485 : vector<8x32xi1>, vector<8x32xf32>
    %c1_i32_111 = arith.constant 1 : i32
    %516 = vector.broadcast %c1_i32_111 : i32 to vector<8x1xi32>
    %517 = arith.cmpi eq, %482, %516 : vector<8x1xi32>
    %cst_112 = arith.constant 0.000000e+00 : f32
    %518 = vector.shape_cast %517 : vector<8x1xi1> to vector<8x1xi1>
    %519 = vector.broadcast %518 : vector<8x1xi1> to vector<8x128xi1>
    %520 = vector.broadcast %cst_112 : f32 to vector<8x128xf32>
    %521 = arith.select %519, %480, %520 : vector<8x128xi1>, vector<8x128xf32>
    %cst_113 = arith.constant dense<0.000000e+00> : vector<128xf32>
    %522 = vector.multi_reduction <add>, %521, %cst_113 [0] : vector<8x128xf32> to vector<128xf32>
    %523 = vector.shape_cast %522 : vector<128xf32> to vector<1x128xf32>
    %cst_114 = arith.constant dense<0.000000e+00> : vector<1x128xf32>
    %524 = tpu.matmul %510, %481, %cst_114 {dimension_numbers = #tpu.dot_dimension_numbers<[1], [0], [0], [1], [0, 0, 1, 1], [], []>} : vector<1x32xf32>, vector<32x128xf32>, vector<1x128xf32> -> vector<1x128xf32>
    %525 = arith.addf %523, %524 : vector<1x128xf32>
    %526 = arith.negf %525 : vector<1x128xf32>
    %527 = math.exp %526 : vector<1x128xf32>
    %cst_115 = arith.constant 1.000000e+00 : f32
    %528 = vector.broadcast %cst_115 : f32 to vector<1x128xf32>
    %529 = arith.addf %528, %527 : vector<1x128xf32>
    %530 = arith.divf %528, %529 : vector<1x128xf32>
    %531 = math.tanh %525 : vector<1x128xf32>
    %532 = vector.extract_strided_slice %530 {offsets = [0, 0], sizes = [1, 32], strides = [1, 1]} : vector<1x128xf32> to vector<1x32xf32>
    %533 = vector.extract_strided_slice %530 {offsets = [0, 32], sizes = [1, 32], strides = [1, 1]} : vector<1x128xf32> to vector<1x32xf32>
    %534 = vector.extract_strided_slice %531 {offsets = [0, 64], sizes = [1, 32], strides = [1, 1]} : vector<1x128xf32> to vector<1x32xf32>
    %535 = vector.extract_strided_slice %530 {offsets = [0, 96], sizes = [1, 32], strides = [1, 1]} : vector<1x128xf32> to vector<1x32xf32>
    %536 = arith.mulf %533, %508 : vector<1x32xf32>
    %537 = arith.mulf %532, %534 : vector<1x32xf32>
    %538 = arith.addf %536, %537 : vector<1x32xf32>
    %539 = math.tanh %538 : vector<1x32xf32>
    %540 = arith.mulf %535, %539 : vector<1x32xf32>
    %541 = vector.shape_cast %517 : vector<8x1xi1> to vector<8x1xi1>
    %542 = vector.broadcast %541 : vector<8x1xi1> to vector<8x32xi1>
    %543 = vector.shape_cast %540 : vector<1x32xf32> to vector<1x32xf32>
    %544 = vector.broadcast %543 : vector<1x32xf32> to vector<8x32xf32>
    %545 = arith.select %542, %544, %515 : vector<8x32xi1>, vector<8x32xf32>
    %c2_i32_116 = arith.constant 2 : i32
    %546 = vector.broadcast %c2_i32_116 : i32 to vector<8x1xi32>
    %547 = arith.cmpi eq, %482, %546 : vector<8x1xi32>
    %cst_117 = arith.constant 0.000000e+00 : f32
    %548 = vector.shape_cast %547 : vector<8x1xi1> to vector<8x1xi1>
    %549 = vector.broadcast %548 : vector<8x1xi1> to vector<8x128xi1>
    %550 = vector.broadcast %cst_117 : f32 to vector<8x128xf32>
    %551 = arith.select %549, %480, %550 : vector<8x128xi1>, vector<8x128xf32>
    %cst_118 = arith.constant dense<0.000000e+00> : vector<128xf32>
    %552 = vector.multi_reduction <add>, %551, %cst_118 [0] : vector<8x128xf32> to vector<128xf32>
    %553 = vector.shape_cast %552 : vector<128xf32> to vector<1x128xf32>
    %cst_119 = arith.constant dense<0.000000e+00> : vector<1x128xf32>
    %554 = tpu.matmul %540, %481, %cst_119 {dimension_numbers = #tpu.dot_dimension_numbers<[1], [0], [0], [1], [0, 0, 1, 1], [], []>} : vector<1x32xf32>, vector<32x128xf32>, vector<1x128xf32> -> vector<1x128xf32>
    %555 = arith.addf %553, %554 : vector<1x128xf32>
    %556 = arith.negf %555 : vector<1x128xf32>
    %557 = math.exp %556 : vector<1x128xf32>
    %cst_120 = arith.constant 1.000000e+00 : f32
    %558 = vector.broadcast %cst_120 : f32 to vector<1x128xf32>
    %559 = arith.addf %558, %557 : vector<1x128xf32>
    %560 = arith.divf %558, %559 : vector<1x128xf32>
    %561 = math.tanh %555 : vector<1x128xf32>
    %562 = vector.extract_strided_slice %560 {offsets = [0, 0], sizes = [1, 32], strides = [1, 1]} : vector<1x128xf32> to vector<1x32xf32>
    %563 = vector.extract_strided_slice %560 {offsets = [0, 32], sizes = [1, 32], strides = [1, 1]} : vector<1x128xf32> to vector<1x32xf32>
    %564 = vector.extract_strided_slice %561 {offsets = [0, 64], sizes = [1, 32], strides = [1, 1]} : vector<1x128xf32> to vector<1x32xf32>
    %565 = vector.extract_strided_slice %560 {offsets = [0, 96], sizes = [1, 32], strides = [1, 1]} : vector<1x128xf32> to vector<1x32xf32>
    %566 = arith.mulf %563, %538 : vector<1x32xf32>
    %567 = arith.mulf %562, %564 : vector<1x32xf32>
    %568 = arith.addf %566, %567 : vector<1x32xf32>
    %569 = math.tanh %568 : vector<1x32xf32>
    %570 = arith.mulf %565, %569 : vector<1x32xf32>
    %571 = vector.shape_cast %547 : vector<8x1xi1> to vector<8x1xi1>
    %572 = vector.broadcast %571 : vector<8x1xi1> to vector<8x32xi1>
    %573 = vector.shape_cast %570 : vector<1x32xf32> to vector<1x32xf32>
    %574 = vector.broadcast %573 : vector<1x32xf32> to vector<8x32xf32>
    %575 = arith.select %572, %574, %545 : vector<8x32xi1>, vector<8x32xf32>
    %c3_i32_121 = arith.constant 3 : i32
    %576 = vector.broadcast %c3_i32_121 : i32 to vector<8x1xi32>
    %577 = arith.cmpi eq, %482, %576 : vector<8x1xi32>
    %cst_122 = arith.constant 0.000000e+00 : f32
    %578 = vector.shape_cast %577 : vector<8x1xi1> to vector<8x1xi1>
    %579 = vector.broadcast %578 : vector<8x1xi1> to vector<8x128xi1>
    %580 = vector.broadcast %cst_122 : f32 to vector<8x128xf32>
    %581 = arith.select %579, %480, %580 : vector<8x128xi1>, vector<8x128xf32>
    %cst_123 = arith.constant dense<0.000000e+00> : vector<128xf32>
    %582 = vector.multi_reduction <add>, %581, %cst_123 [0] : vector<8x128xf32> to vector<128xf32>
    %583 = vector.shape_cast %582 : vector<128xf32> to vector<1x128xf32>
    %cst_124 = arith.constant dense<0.000000e+00> : vector<1x128xf32>
    %584 = tpu.matmul %570, %481, %cst_124 {dimension_numbers = #tpu.dot_dimension_numbers<[1], [0], [0], [1], [0, 0, 1, 1], [], []>} : vector<1x32xf32>, vector<32x128xf32>, vector<1x128xf32> -> vector<1x128xf32>
    %585 = arith.addf %583, %584 : vector<1x128xf32>
    %586 = arith.negf %585 : vector<1x128xf32>
    %587 = math.exp %586 : vector<1x128xf32>
    %cst_125 = arith.constant 1.000000e+00 : f32
    %588 = vector.broadcast %cst_125 : f32 to vector<1x128xf32>
    %589 = arith.addf %588, %587 : vector<1x128xf32>
    %590 = arith.divf %588, %589 : vector<1x128xf32>
    %591 = math.tanh %585 : vector<1x128xf32>
    %592 = vector.extract_strided_slice %590 {offsets = [0, 0], sizes = [1, 32], strides = [1, 1]} : vector<1x128xf32> to vector<1x32xf32>
    %593 = vector.extract_strided_slice %590 {offsets = [0, 32], sizes = [1, 32], strides = [1, 1]} : vector<1x128xf32> to vector<1x32xf32>
    %594 = vector.extract_strided_slice %591 {offsets = [0, 64], sizes = [1, 32], strides = [1, 1]} : vector<1x128xf32> to vector<1x32xf32>
    %595 = vector.extract_strided_slice %590 {offsets = [0, 96], sizes = [1, 32], strides = [1, 1]} : vector<1x128xf32> to vector<1x32xf32>
    %596 = arith.mulf %593, %568 : vector<1x32xf32>
    %597 = arith.mulf %592, %594 : vector<1x32xf32>
    %598 = arith.addf %596, %597 : vector<1x32xf32>
    %599 = math.tanh %598 : vector<1x32xf32>
    %600 = arith.mulf %595, %599 : vector<1x32xf32>
    %601 = vector.shape_cast %577 : vector<8x1xi1> to vector<8x1xi1>
    %602 = vector.broadcast %601 : vector<8x1xi1> to vector<8x32xi1>
    %603 = vector.shape_cast %600 : vector<1x32xf32> to vector<1x32xf32>
    %604 = vector.broadcast %603 : vector<1x32xf32> to vector<8x32xf32>
    %605 = arith.select %602, %604, %575 : vector<8x32xi1>, vector<8x32xf32>
    %c4_i32_126 = arith.constant 4 : i32
    %c0_127 = arith.constant 0 : index
    %c0_128 = arith.constant 0 : index
    %606 = vector.load %arg12[%c0_127, %c0_128] : memref<32x2xf32, #tpu.memory_space<vmem>>, vector<32x2xf32>
    %cst_129 = arith.constant dense<0.000000e+00> : vector<8x2xf32>
    %607 = tpu.matmul %605, %606, %cst_129 {dimension_numbers = #tpu.dot_dimension_numbers<[1], [0], [0], [1], [0, 0, 1, 1], [], []>} : vector<8x32xf32>, vector<32x2xf32>, vector<8x2xf32> -> vector<8x2xf32>
    %c0_130 = arith.constant 0 : index
    %c0_131 = arith.constant 0 : index
    %608 = vector.load %arg13[%c0_130, %c0_131] : memref<1x2xf32, #tpu.memory_space<vmem>>, vector<1x2xf32>
    %609 = vector.broadcast %608 : vector<1x2xf32> to vector<8x2xf32>
    %610 = arith.addf %607, %609 : vector<8x2xf32>
    %cst_132 = arith.constant dense<0xFF800000> : vector<8xf32>
    %611 = vector.multi_reduction <maximumf>, %610, %cst_132 [1] : vector<8x2xf32> to vector<8xf32>
    %612 = vector.shape_cast %611 : vector<8xf32> to vector<8x1xf32>
    %613 = vector.broadcast %612 : vector<8x1xf32> to vector<8x2xf32>
    %614 = arith.subf %610, %613 : vector<8x2xf32>
    %615 = math.exp %614 : vector<8x2xf32>
    %cst_133 = arith.constant dense<0.000000e+00> : vector<8xf32>
    %616 = vector.multi_reduction <add>, %615, %cst_133 [1] : vector<8x2xf32> to vector<8xf32>
    %617 = vector.shape_cast %616 : vector<8xf32> to vector<8x1xf32>
    %618 = math.log %617 : vector<8x1xf32>
    %619 = arith.addf %612, %618 : vector<8x1xf32>
    %620 = vector.broadcast %619 : vector<8x1xf32> to vector<8x2xf32>
    %621 = arith.subf %610, %620 : vector<8x2xf32>
    %c0_134 = arith.constant 0 : index
    %c0_135 = arith.constant 0 : index
    %622 = vector.load %arg14[%c0_134, %c0_135] : memref<8x2xf32, #tpu.memory_space<vmem>>, vector<8x2xf32>
    tpu.vector_store %arg14[%c0_134, %c0_135], %621 {strides = array<i32>} : memref<8x2xf32, #tpu.memory_space<vmem>>, vector<8x2xf32>,
    return
  }
}

</mosaic_0001>

<bundles_post_ra>
// kernel: tpu_custom_call.1
= control target key start
LH: loop header
LB: loop body
LE: loop exit
PB: predicated region body
PF: predicated region fallthrough
CT: control target
= control target key end

     0   :  { %19 = vsyncpa [#allocation5], 0  ;;  %s2859_s0 = inlined_call_operand.vmem [shape: f32[64,16], index: 0, kind: input, shape index: {}]   ;;  %s2860_s1 = inlined_call_operand.vmem [shape: s32[8,1], index: 1, kind: input, shape index: {}]   ;;  %s2861_s2 = inlined_call_operand.hbm [shape: f32[16,128], index: 2, kind: input, shape index: {}]   ;;  %s2862_s3 = inlined_call_operand.vmem [shape: f32[32,128], index: 3, kind: input, shape index: {}]   ;;  %s2863_s4 = inlined_call_operand.vmem [shape: f32[1,128], index: 4, kind: input, shape index: {}]   ;;  %s2864_s5 = inlined_call_operand.hbm [shape: f32[16,128], index: 5, kind: input, shape index: {}]   ;;  %s2865_s6 = inlined_call_operand.vmem [shape: f32[32,128], index: 6, kind: input, shape index: {}]   ;;  %s2866_s7 = inlined_call_operand.vmem [shape: f32[1,128], index: 7, kind: input, shape index: {}]   ;;  %s2867_s8 = inlined_call_operand.vmem [shape: f32[32,128], index: 8, kind: input, shape index: {}]   ;;  %s2868_s9 = inlined_call_operand.hbm [shape: f32[32,128], index: 9, kind: input, shape index: {}]   ;;  %s2869_s10 = inlined_call_operand.hbm [shape: f32[32,128], index: 10, kind: input, shape index: {}]   ;;  %s2870_s11 = inlined_call_operand.vmem [shape: f32[1,128], index: 11, kind: input, shape index: {}]   ;;  %s2871_s12 = inlined_call_operand.vmem [shape: f32[32,2], index: 12, kind: input, shape index: {}]   ;;  %s2872_s13 = inlined_call_operand.vmem [shape: f32[1,2], index: 13, kind: input, shape index: {}]   ;;  %s2873_s14 = inlined_call_operand.vmem [shape: f32[8,2], index: 14, kind: output, shape index: {}]  }
   0x1   :  { %20 = vsyncpa [#allocation7], 0 }
   0x2   :  { %21 = vsyncpa [#allocation10], 0  ;;  %s47_s15 = sshll.u32 %s2864_s5, 4  ;;  %s2125_s16 = smov [#allocation6]   ;;  %s48_s15 = int_to_ptr.hbm [resolvable:$true] %s47_s15 }
   0x3   :  { %s49_s17 = sshll.u32 %s2125_s16, 4  ;;  %s30_s20 = sshll.u32 %s2861_s2, 4  ;;  %s50_s17 = int_to_ptr.vmem [resolvable:$true] %s49_s17  ;;  %s31_s20 = int_to_ptr.hbm [resolvable:$true] %s30_s20 }
   0x4   :  { %s2126_s21 = smov 128   ;;  %s2127_s22 = smov 8  }
   0x5   :  { %55 = dma.hbm_to_vmem [thread:$0]  %s48_s15, 256, %s50_s17, [#allocation7], %s2126_s21, %s2126_s21, %s2127_s22  }
   0x6   :  { %s2128_s23 = smov [#allocation4]   ;;  %s66_s27 = sshll.u32 %s2868_s9, 4  ;;  %s67_s27 = int_to_ptr.hbm [resolvable:$true] %s66_s27 }
   0x7   :  { %s32_s24 = sshll.u32 %s2128_s23, 4  ;;  %s79_s29 = sshll.u32 %s2869_s10, 4  ;;  %s33_s24 = int_to_ptr.vmem [resolvable:$true] %s32_s24  ;;  %s80_s29 = int_to_ptr.hbm [resolvable:$true] %s79_s29 }
   0x8   :  { %38 = dma.hbm_to_vmem [thread:$0]  %s31_s20, 256, %s33_s24, [#allocation5], %s2126_s21, %s2126_s21, %s2127_s22  }
   0x9   :  { %s2129_s30 = smov [#allocation8]   ;;  %s2130_s2 = smov [#allocation9]  }
   0xa   :  { %s68_s16 = sshll.u32 %s2129_s30, 4  ;;  %s81_s15 = sshll.u32 %s2130_s2, 4  ;;  %s69_s16 = int_to_ptr.vmem [resolvable:$true] %s68_s16  ;;  %s82_s15 = int_to_ptr.vmem [resolvable:$true] %s81_s15 }
   0xb   :  { %74 = dma.hbm_to_vmem [thread:$0]  %s67_s27, 512, %s69_s16, [#allocation7], %s2126_s21, %s2126_s21, %s2127_s22  }
   0xc   :  { %87 = dma.hbm_to_vmem [thread:$0]  %s80_s29, 512, %s82_s15, [#allocation10], %s2126_s21, %s2126_s21, %s2127_s22  }
   0xd   :  { %2119 = dma.done.wait [#allocation5], 256  }
   0xe   :  { %2120 = vsyncadd [#allocation5], 4294967040 }
   0xf   :  { %2121 = dma.done.wait [#allocation7], 768  }
  0x10   :  { %2122 = vsyncadd [#allocation7], 4294966528 }
  0x11   :  { %2123 = dma.done.wait [#allocation10], 512  }
  0x12   :  { %2124 = vsyncadd [#allocation10], 4294966784  ;;  %v199_v0 = vld [vmem:[#allocation6 + $0x8] sm:$0xff]  ;;  %v198_v2 = vld [vmem:[#allocation6] sm:$0xff]  ;;  %vm124_vm0 = vcmask 130048   ;;  %v2131_v9 = vmov 0.0  }
  0x13   :  { %v2225_v1 = vld [vmem:[%s2862_s3 + $0x18] sm:$0xff]  ;;  %218 = vmatpush.msra.mxu1 %v199_v0  ;;  %v2231_v3 = vld [vmem:[%s2862_s3 + $0x10] sm:$0xff]  ;;  %v110_v4 = vld [vmem:[%s2859_s0] sm:$0xff]  ;;  %v2133_v51 = vmov 0   ;;  %vm263_vm13 = vcmask 261120  }
  0x14   :  { %279 = vmatpush.msra.mxu2 %v2225_v1  ;;  %v2239_v5 = vld [vmem:[%s2862_s3 + $0x8] sm:$0xff]  ;;  %v118_v7 = vld [vmem:[#allocation4] sm:$0xff]  ;;  %v2261_v11 = vld [vmem:[%s2865_s6 + $0x18] sm:$0xff]  ;;  %1843 = vset.pattern.permute.xlu0 %v2133_v51 }
  0x15   :  { %v119_v6 = vld [vmem:[#allocation4 + $0x8] sm:$0xff]  ;;  %219 = vmatpush.msra.mxu1 %v198_v2  ;;  %v2246_v8 = vld [vmem:[%s2862_s3] sm:$0xff]  ;;  %v2266_v12 = vld [vmem:[%s2865_s6 + $0x10] sm:$0xff]  ;;  %346 = vmatpush.msra.mxu3 %v2261_v11 }
  0x16   :  { %280 = vmatpush.msra.mxu2 %v2231_v3  ;;  %1785 = vmatmul.msk.f32.vlgmr.msra.gmra.mxu1 %vm124_vm0, %v110_v4  ;;  %v111_v10 = vld [vmem:[%s2859_s0 + $0x8] sm:$0xff]  ;;  %v112_v13 = vld [vmem:[%s2859_s0 + $0x10] sm:$0xff]  ;;  %v2287_v15 = vld [vmem:[%s2865_s6] sm:$0xff] }
  0x17   :  { %163 = vmatpush.msra.mxu0 %v119_v6  ;;  %347 = vmatpush.msra.mxu3 %v2266_v12  ;;  %v2282_v14 = vld [vmem:[%s2865_s6 + $0x8] sm:$0xff]  ;;  %v113_v16 = vld [vmem:[%s2859_s0 + $0x18] sm:$0xff]  ;;  %v114_v17 = vld [vmem:[%s2859_s0 + $0x20] sm:$0xff] }
  0x18   :  { %281 = vmatpush.msra.mxu2 %v2239_v5  ;;  %v115_v18 = vld [vmem:[%s2859_s0 + $0x28] sm:$0xff]  ;;  %v116_v19 = vld [vmem:[%s2859_s0 + $0x30] sm:$0xff]  ;;  %v117_v20 = vld [vmem:[%s2859_s0 + $0x38] sm:$0xff]  ;;  %s2132_s0 = smov 64   ;;  %1844 = vset.pattern.permute.xlu1 %v2133_v51 }
  0x19   :  { %164 = vmatpush.msra.mxu0 %v118_v7  ;;  %348 = vmatpush.msra.mxu3 %v2282_v14  ;;  %v1846_v21 = vld [vmem:[%s2866_s7] ss:$0 sm:$0xff] }
  0x1a   :  { %282 = vmatpush.msra.mxu2 %v2246_v8  ;;  %1777 = vmatmul.msk.f32.vlgmr.msra.gmra.mxu0 %vm124_vm0, %v110_v4  ;;  %v2336_v24 = vld [vmem:[%s2863_s4] ss:$0 sm:$0xff] }
  0x1b   :  { %283 = vmatmul.f32.vlgmr.msra.gmra.mxu2 %v2131_v9  ;;  %349 = vmatpush.msra.mxu3 %v2287_v15  ;;  %v2356_v50 = vld [vmem:[%s2860_s1] sm:$0xff]  ;;  %s2134_s1 = smov 32  }
  0x1c   :  { %418 = vmatpush.msrb.mxu2 %v2225_v1  ;;  %350 = vmatmul.f32.vlgmr.msra.gmra.mxu3 %v2131_v9  ;;  %vm325_vm1 = vcmp.gt.s32.totalorder %v2356_v50, 0  ;;  %vm392_vm10 = vcmp.gt.s32.totalorder %v2356_v50, 7 }
  0x1d   :  { %490 = vmatpush.msrb.mxu3 %v2261_v11  ;;  %v326_v52 = vsel %vm325_vm1, 1, %v2133_v51  ;;  %1845 = vset.pattern.permute.xlu2 %v2133_v51 }
  0x1e   :  { %419 = vmatpush.msrb.mxu2 %v2231_v3  ;;  %1786 = vmatmul.msk.f32.gmra.mxu1 %vm124_vm0, %v111_v10 }
  0x1f   :  { %491 = vmatpush.msrb.mxu3 %v2266_v12 }
  0x20   :  { %420 = vmatpush.msrb.mxu2 %v2239_v5 }
  0x21   :  { %492 = vmatpush.msrb.mxu3 %v2282_v14 }
  0x22   :  { %421 = vmatpush.msrb.mxu2 %v2246_v8  ;;  %1778 = vmatmul.msk.f32.gmra.mxu0 %vm124_vm0, %v111_v10 }
  0x23   :  { %493 = vmatpush.msrb.mxu3 %v2287_v15 }
  0x24   :  { %562 = vmatpush.msra.mxu2 %v2225_v1 }
  0x25   :  { %634 = vmatpush.msra.mxu3 %v2261_v11 }
  0x26   :  { %563 = vmatpush.msra.mxu2 %v2231_v3  ;;  %1787 = vmatmul.msk.f32.gmra.mxu1 %vm124_vm0, %v112_v13 }
  0x27   :  { %635 = vmatpush.msra.mxu3 %v2266_v12 }
  0x28   :  { %564 = vmatpush.msra.mxu2 %v2239_v5 }
  0x29   :  { %636 = vmatpush.msra.mxu3 %v2282_v14 }
  0x2a   :  { %565 = vmatpush.msra.mxu2 %v2246_v8  ;;  %1779 = vmatmul.msk.f32.gmra.mxu0 %vm124_vm0, %v112_v13 }
  0x2b   :  { %637 = vmatpush.msra.mxu3 %v2287_v15 }
  0x2e   :  { %1788 = vmatmul.msk.f32.gmra.mxu1 %vm124_vm0, %v113_v16 }
  0x32   :  { %1780 = vmatmul.msk.f32.gmra.mxu0 %vm124_vm0, %v113_v16 }
  0x36   :  { %1789 = vmatmul.msk.f32.gmra.mxu1 %vm124_vm0, %v114_v17 }
  0x3a   :  { %1781 = vmatmul.msk.f32.gmra.mxu0 %vm124_vm0, %v114_v17 }
  0x3e   :  { %1790 = vmatmul.msk.f32.gmra.mxu1 %vm124_vm0, %v115_v18 }
  0x42   :  { %1782 = vmatmul.msk.f32.gmra.mxu0 %vm124_vm0, %v115_v18 }
  0x46   :  { %1791 = vmatmul.msk.f32.gmra.mxu1 %vm124_vm0, %v116_v19 }
  0x4a   :  { %1783 = vmatmul.msk.f32.gmra.mxu0 %vm124_vm0, %v116_v19 }
  0x4e   :  { %1792 = vmatmul.msk.f32.gmra.mxu1 %vm124_vm0, %v117_v20 }
  0x52   :  { %1784 = vmatmul.msk.f32.gmra.mxu0 %vm124_vm0, %v117_v20 }
  0x93   :  { %v221_v22 = vpop.f32.mrf.mxu1 }
  0x94   :  { %v2331_v23 = vadd.f32 %v1846_v21, %v221_v22 }
  0x97   :  { %v166_v25 = vpop.f32.mrf.mxu0 }
  0x98   :  { %v167_v26 = vadd.f32 %v2336_v24, %v166_v25 }
  0x9b   :  { %v224_v27 = vpop.f32.mrf.mxu1 }
  0x9c   :  { %v2339_v28 = vadd.f32 %v1846_v21, %v224_v27  ;;  %v393_v27 = vsel %vm392_vm10, 1, %v2133_v51 }
  0x9e   :  { %v284_v29 = vpop.f32.mrf.mxu2 }
  0x9f   :  { %v287_v30 = vadd.f32 %v284_v29, %v167_v26  ;;  %v351_v43 = vpop.f32.mrf.mxu3 }
  0xa1   :  { %1850 = vtanh.f32 %v287_v30  ;;  %v1793_v47 = vmul.f32 -1.442695, %v287_v30 }
  0xa3   :  { %v227_v31 = vpop.f32.mrf.mxu1 }
  0xa4   :  { %v2341_v32 = vadd.f32 %v1846_v21, %v227_v31 }
  0xa7   :  { %v1851_v33 = vpop.eup %1850 }
  0xa8   :  { %310 = vrot.lane.b32.xlu0 %v1851_v33, %s2132_s0 }
  0xab   :  { %v230_v34 = vpop.f32.mrf.mxu1 }
  0xac   :  { %v2344_v35 = vadd.f32 %v1846_v21, %v230_v34 }
  0xb3   :  { %v233_v36 = vpop.f32.mrf.mxu1 }
  0xb4   :  { %v2346_v37 = vadd.f32 %v1846_v21, %v233_v36 }
  0xbb   :  { %v236_v38 = vpop.f32.mrf.mxu1 }
  0xbc   :  { %v2348_v39 = vadd.f32 %v1846_v21, %v236_v38 }
  0xc3   :  { %v239_v40 = vpop.f32.mrf.mxu1 }
  0xc4   :  { %v2350_v41 = vadd.f32 %v1846_v21, %v239_v40 }
  0xcb   :  { %v242_v42 = vpop.f32.mrf.mxu1 }
  0xcc   :  { %v243_v44 = vadd.f32 %v1846_v21, %v242_v42 }
  0xce   :  { %v354_v45 = vadd.f32 %v351_v43, %v243_v44 }
  0xd0   :  { %1852 = vtanh.f32 %v354_v45  ;;  %v1794_v2 = vmul.f32 -1.442695, %v354_v45 }
  0xd1   :  { %1854 = vpow2.f32 %v1793_v47 }
  0xd6   :  { %v1853_v46 = vpop.eup %1852 }
  0xd7   :  { %377 = vrot.lane.b32.xlu0 %v1853_v46, %s2132_s0  ;;  %v1855_v48 = vpop.eup %1854 }
  0xd8   :  { %v291_v49 = vadd.f32 1.0, %v1855_v48 }
  0xda   :  { %1856 = vrcp.f32 %v291_v49  ;;  %vm297_vm2 = vweird.f32 %v291_v49  ;;  %v303_v57 = vand.u32 2147483648, %v291_v49  ;;  %v301_v59 = vand.u32 2147483647, %v291_v49 }
  0xdb   :  { %1858 = vpow2.f32 %v1794_v2 }
  0xdc   :  { %v304_v60 = vor.u32 1.1754944e-38, %v303_v57  ;;  %vm302_vm5 = vcmp.eq.f32.partialorder %v301_v59, 8.507059e+37 }
  0xdf   :  { %328 = vperm.xlu0 %1843, %v326_v52  }
  0xe0   :  { %v1857_v53 = vpop.eup %1856 }
  0xe1   :  { %v293_v54 = vmul.f32 %v1857_v53, %v291_v49  ;;  %vm298_vm3 = vweird.f32 %v1857_v53  ;;  %v1859_v4 = vpop.eup %1858 }
  0xe2   :  { %vm299_vm4 = vmor %vm297_vm2, %vm298_vm3  ;;  %v358_v6 = vadd.f32 1.0, %v1859_v4 }
  0xe3   :  { %v294_v55 = vsub.f32 1.0, %v293_v54  ;;  %v169_v54 = vpop.f32.mrf.mxu0 }
  0xe4   :  { %1860 = vrcp.f32 %v358_v6  ;;  %v370_v18 = vand.u32 2147483648, %v358_v6  ;;  %vm364_vm7 = vweird.f32 %v358_v6  ;;  %v368_v19 = vand.u32 2147483647, %v358_v6 }
  0xe5   :  { %v295_v56 = vmul.f32 %v1857_v53, %v294_v55  ;;  %v170_v55 = vadd.f32 %v2336_v24, %v169_v54 }
  0xe6   :  { %v371_v21 = vor.u32 1.1754944e-38, %v370_v18  ;;  %vm369_vm9 = vcmp.eq.f32.partialorder %v368_v19, 8.507059e+37 }
  0xe7   :  { %v296_v58 = vadd.f32 %v1857_v53, %v295_v56 }
  0xe9   :  { %v300_v61 = vsel %vm299_vm4, %v1857_v53, %v296_v58 }
  0xea   :  { %v305_v63 = vsel %vm302_vm5, %v304_v60, %v300_v61  ;;  %v1861_v7 = vpop.eup %1860 }
  0xeb   :  { %v360_v10 = vmul.f32 %v1861_v7, %v358_v6  ;;  %vm365_vm6 = vweird.f32 %v1861_v7  ;;  %v308_v29 = vmul.f32 0.0, %v305_v63 }
  0xec   :  { %vm366_vm8 = vmor %vm364_vm7, %vm365_vm6  ;;  %vm464_vm6 = vcmp.gt.s32.totalorder %v2356_v50, 1  ;;  %vm536_vm7 = vcmp.gt.s32.totalorder %v2356_v50, 6 }
  0xed   :  { %v361_v13 = vsub.f32 1.0, %v360_v10 }
  0xef   :  { %v362_v16 = vmul.f32 %v1861_v7, %v361_v13 }
  0xf1   :  { %v363_v17 = vadd.f32 %v1861_v7, %v362_v16 }
  0xf3   :  { %v367_v20 = vsel %vm366_vm8, %v1861_v7, %v363_v17 }
  0xf4   :  { %v372_v22 = vsel %vm369_vm9, %v371_v21, %v367_v20 }
  0xf5   :  { %v375_v34 = vmul.f32 0.0, %v372_v22 }
 0x11a   :  { %v311_v62 = vpop.permute.xlu0 %310 }
 0x11b   :  { %v313_v0 = vmul.f32 %v311_v62, %v305_v63 }
 0x11d   :  { %315 = vrot.lane.b32.xlu1 %v313_v0, %s2134_s1 }
 0x149   :  { %v378_v25 = vpop.permute.xlu0 %377 }
 0x14a   :  { %v380_v26 = vmul.f32 %v378_v25, %v372_v22 }
 0x14c   :  { %382 = vrot.lane.b32.xlu1 %v380_v26, %s2134_s1 }
 0x151   :  { %v2375_v42 = vpop.permute.xlu0 %328 }
 0x152   :  { %vm330_vm11 = vcmp.eq.s32.totalorder %v2375_v42, 1  ;;  %v1421_v42 = vld [vmem:[#allocation9] sm:$0xff] }
 0x154   :  { %395 = vperm.xlu1 %1844, %v393_v27  }
 0x18f   :  { %v316_v30 = vpop.permute.xlu1 %315 }
 0x190   :  { %v2367_v31 = vadd.f32 %v316_v30, %v308_v29 }
 0x192   :  { %1862 = vtanh.f32 %v2367_v31 }
 0x198   :  { %v1863_v33 = vpop.eup %1862 }
 0x199   :  { %321 = vrot.lane.b32.xlu2 %v1863_v33, %s2132_s0 }
 0x1be   :  { %v383_v36 = vpop.permute.xlu1 %382 }
 0x1bf   :  { %v2371_v38 = vadd.f32 %v383_v36, %v375_v34 }
 0x1c1   :  { %1864 = vtanh.f32 %v2371_v38 }
 0x1c6   :  { %v2384_v46 = vpop.permute.xlu1 %395 }
 0x1c7   :  { %v1865_v40 = vpop.eup %1864  ;;  %vm397_vm12 = vcmp.eq.s32.totalorder %v2384_v46, 1  ;;  %v1358_v46 = vld [vmem:[%s2867_s8] sm:$0xff] }
 0x1c8   :  { %388 = vrot.lane.b32.xlu2 %v1865_v40, %s2132_s0 }
 0x1f3   :  { %v322_v43 = vpop.permute.xlu2 %321 }
 0x1f4   :  { %v324_v44 = vmul.f32 %v322_v43, %v305_v63 }
 0x1f6   :  { %v2380_v45 = vsel %vm330_vm11, %v324_v44, 0.0 }
 0x1f7   :  { %402 = vrot.lane.b32.xlu2 %v2380_v45, %s2134_s1 }
 0x222   :  { %v389_v47 = vpop.permute.xlu2 %388 }
 0x223   :  { %v391_v48 = vmul.f32 %v389_v47, %v372_v22 }
 0x225   :  { %v2389_v49 = vsel %vm397_vm12, %v391_v48, 0.0 }
 0x226   :  { %474 = vrot.lane.b32.xlu1 %v2389_v49, %s2134_s1 }
 0x251   :  { %v403_v52 = vpop.permute.xlu2 %402 }
 0x252   :  { %1795 = vmatmul.msk.f32.vlgmr.msrb.gmra.mxu2 %vm263_vm13, %v403_v52  ;;  %v465_v52 = vsel %vm464_vm6, 1, %v2133_v51  ;;  %vm680_vm6 = vcmp.gt.s32.totalorder %v2356_v50, 5 }
 0x253   :  { %706 = vmatpush.msrb.mxu2 %v2225_v1 }
 0x255   :  { %707 = vmatpush.msrb.mxu2 %v2231_v3 }
 0x257   :  { %708 = vmatpush.msrb.mxu2 %v2239_v5 }
 0x259   :  { %709 = vmatpush.msrb.mxu2 %v2246_v8 }
 0x298   :  { %v475_v53 = vpop.permute.xlu1 %474 }
 0x299   :  { %1797 = vmatmul.msk.f32.vlgmr.msrb.gmra.mxu3 %vm263_vm13, %v475_v53  ;;  %v2414_v53 = vsel %vm330_vm11, %v2367_v31, 0.0  ;;  %v2426_v31 = vsel %vm397_vm12, %v2371_v38, 0.0 }
 0x29a   :  { %778 = vmatpush.msrb.mxu3 %v2261_v11 }
 0x29c   :  { %779 = vmatpush.msrb.mxu3 %v2266_v12 }
 0x29e   :  { %780 = vmatpush.msrb.mxu3 %v2282_v14 }
 0x2a0   :  { %781 = vmatpush.msrb.mxu3 %v2287_v15 }
 0x2d5   :  { %v423_v56 = vpop.f32.mrf.mxu2 }
 0x2d6   :  { %v426_v57 = vadd.f32 %v423_v56, %v170_v55 }
 0x2d8   :  { %1866 = vtanh.f32 %v426_v57  ;;  %v1796_v59 = vmul.f32 -1.442695, %v426_v57 }
 0x2da   :  { %1868 = vpow2.f32 %v1796_v59 }
 0x2de   :  { %v1867_v58 = vpop.eup %1866 }
 0x2df   :  { %449 = vrot.lane.b32.xlu2 %v1867_v58, %s2132_s0  ;;  %v537_v58 = vsel %vm536_vm7, 1, %v2133_v51 }
 0x2e0   :  { %v1869_v60 = vpop.eup %1868 }
 0x2e1   :  { %v430_v61 = vadd.f32 1.0, %v1869_v60 }
 0x2e3   :  { %1870 = vrcp.f32 %v430_v61  ;;  %v442_v13 = vand.u32 2147483648, %v430_v61  ;;  %vm436_vm15 = vweird.f32 %v430_v61  ;;  %v440_v16 = vand.u32 2147483647, %v430_v61 }
 0x2e5   :  { %v443_v18 = vor.u32 1.1754944e-38, %v442_v13  ;;  %vm441_vm1 = vcmp.eq.f32.partialorder %v440_v16, 8.507059e+37 }
 0x2e9   :  { %v1871_v0 = vpop.eup %1870 }
 0x2ea   :  { %v432_v4 = vmul.f32 %v1871_v0, %v430_v61  ;;  %vm437_vm14 = vweird.f32 %v1871_v0 }
 0x2eb   :  { %vm438_vm0 = vmor %vm436_vm15, %vm437_vm14 }
 0x2ec   :  { %v433_v6 = vsub.f32 1.0, %v432_v4 }
 0x2ee   :  { %v434_v7 = vmul.f32 %v1871_v0, %v433_v6 }
 0x2f0   :  { %v435_v10 = vadd.f32 %v1871_v0, %v434_v7 }
 0x2f2   :  { %v439_v17 = vsel %vm438_vm0, %v1871_v0, %v435_v10 }
 0x2f3   :  { %v444_v20 = vsel %vm441_vm1, %v443_v18, %v439_v17 }
 0x2f4   :  { %v447_v54 = vmul.f32 %v444_v20, %v2414_v53 }
 0x31c   :  { %v495_v62 = vpop.f32.mrf.mxu3 }
 0x31d   :  { %v498_v63 = vadd.f32 %v495_v62, %v2350_v41 }
 0x31f   :  { %1872 = vtanh.f32 %v498_v63  ;;  %v1798_v21 = vmul.f32 -1.442695, %v498_v63 }
 0x321   :  { %1874 = vpow2.f32 %v1798_v21 }
 0x325   :  { %v1873_v2 = vpop.eup %1872 }
 0x326   :  { %521 = vrot.lane.b32.xlu0 %v1873_v2, %s2132_s0 }
 0x327   :  { %v1875_v22 = vpop.eup %1874 }
 0x328   :  { %v502_v25 = vadd.f32 1.0, %v1875_v22 }
 0x32a   :  { %1876 = vrcp.f32 %v502_v25  ;;  %v514_v34 = vand.u32 2147483648, %v502_v25  ;;  %vm508_vm3 = vweird.f32 %v502_v25  ;;  %v512_v36 = vand.u32 2147483647, %v502_v25 }
 0x32c   :  { %v515_v43 = vor.u32 1.1754944e-38, %v514_v34  ;;  %vm513_vm5 = vcmp.eq.f32.partialorder %v512_v36, 8.507059e+37 }
 0x330   :  { %v1877_v26 = vpop.eup %1876 }
 0x331   :  { %v504_v27 = vmul.f32 %v1877_v26, %v502_v25  ;;  %vm509_vm2 = vweird.f32 %v1877_v26 }
 0x332   :  { %vm510_vm4 = vmor %vm508_vm3, %vm509_vm2 }
 0x333   :  { %v505_v29 = vsub.f32 1.0, %v504_v27 }
 0x335   :  { %v506_v30 = vmul.f32 %v1877_v26, %v505_v29 }
 0x337   :  { %v507_v33 = vadd.f32 %v1877_v26, %v506_v30 }
 0x339   :  { %v450_v19 = vpop.permute.xlu2 %449  ;;  %v511_v40 = vsel %vm510_vm4, %v1877_v26, %v507_v33 }
 0x33a   :  { %v452_v41 = vmul.f32 %v450_v19, %v444_v20  ;;  %v516_v47 = vsel %vm513_vm5, %v515_v43, %v511_v40  ;;  %vm608_vm5 = vcmp.gt.s32.totalorder %v2356_v50, 2 }
 0x33b   :  { %v519_v59 = vmul.f32 %v516_v47, %v2426_v31 }
 0x33c   :  { %454 = vrot.lane.b32.xlu1 %v452_v41, %s2134_s1 }
 0x398   :  { %v522_v44 = vpop.permute.xlu0 %521 }
 0x399   :  { %v524_v48 = vmul.f32 %v522_v44, %v516_v47 }
 0x39b   :  { %526 = vrot.lane.b32.xlu2 %v524_v48, %s2134_s1 }
 0x3a3   :  { %467 = vperm.xlu2 %1845, %v465_v52  }
 0x3ae   :  { %v455_v55 = vpop.permute.xlu1 %454 }
 0x3af   :  { %v2417_v56 = vadd.f32 %v455_v55, %v447_v54 }
 0x3b1   :  { %1878 = vtanh.f32 %v2417_v56 }
 0x3b7   :  { %v1879_v57 = vpop.eup %1878 }
 0x3b8   :  { %460 = vrot.lane.b32.xlu0 %v1879_v57, %s2132_s0 }
 0x3c0   :  { %539 = vperm.xlu0 %1843, %v537_v58  }
 0x3f5   :  { %v527_v60 = vpop.permute.xlu2 %526 }
 0x3f6   :  { %v2429_v61 = vadd.f32 %v527_v60, %v519_v59 }
 0x3f8   :  { %1880 = vtanh.f32 %v2429_v61 }
 0x3fd   :  { %v2433_v63 = vpop.permute.xlu2 %467 }
 0x3fe   :  { %v1881_v62 = vpop.eup %1880  ;;  %vm469_vm8 = vcmp.eq.s32.totalorder %v2433_v63, 1  ;;  %v1361_v63 = vld [vmem:[%s2867_s8 + $0x18] sm:$0xff] }
 0x3ff   :  { %532 = vrot.lane.b32.xlu1 %v1881_v62, %s2132_s0  ;;  %1408 = vmatpush.msrb.mxu1 %v1361_v63 }
 0x42a   :  { %v461_v0 = vpop.permute.xlu0 %460 }
 0x42b   :  { %v463_v2 = vmul.f32 %v461_v0, %v444_v20 }
 0x42d   :  { %v2439_v38 = vsel %vm469_vm8, %v463_v2, %v2380_v45 }
 0x42e   :  { %546 = vrot.lane.b32.xlu1 %v2439_v38, %s2134_s1 }
 0x432   :  { %v2443_v4 = vpop.permute.xlu0 %539 }
 0x433   :  { %vm541_vm9 = vcmp.eq.s32.totalorder %v2443_v4, 1 }
 0x471   :  { %v533_v6 = vpop.permute.xlu1 %532 }
 0x472   :  { %v535_v7 = vmul.f32 %v533_v6, %v516_v47 }
 0x474   :  { %v2449_v10 = vsel %vm541_vm9, %v535_v7, %v2389_v49  ;;  %v172_v49 = vpop.f32.mrf.mxu0 }
 0x475   :  { %618 = vrot.lane.b32.xlu2 %v2449_v10, %s2134_s1  ;;  %v173_v16 = vadd.f32 %v2336_v24, %v172_v49 }
 0x4a0   :  { %v547_v13 = vpop.permute.xlu1 %546 }
 0x4a1   :  { %1799 = vmatmul.msk.f32.vlgmr.msra.gmra.mxu2 %vm263_vm13, %v547_v13 }
 0x4a2   :  { %850 = vmatpush.msra.mxu2 %v2225_v1 }
 0x4a4   :  { %851 = vmatpush.msra.mxu2 %v2231_v3 }
 0x4a6   :  { %852 = vmatpush.msra.mxu2 %v2239_v5 }
 0x4a8   :  { %853 = vmatpush.msra.mxu2 %v2246_v8 }
 0x4cf   :  { %v619_v45 = vpop.permute.xlu2 %618 }
 0x4d0   :  { %1801 = vmatmul.msk.f32.vlgmr.msra.gmra.mxu3 %vm263_vm13, %v619_v45 }
 0x4d1   :  { %916 = vmatpush.msra.mxu3 %v2261_v11 }
 0x4d3   :  { %917 = vmatpush.msra.mxu3 %v2266_v12 }
 0x4d5   :  { %918 = vmatpush.msra.mxu3 %v2282_v14 }
 0x4d7   :  { %919 = vmatpush.msra.mxu3 %v2287_v15 }
 0x524   :  { %v567_v17 = vpop.f32.mrf.mxu2 }
 0x525   :  { %v570_v18 = vadd.f32 %v567_v17, %v173_v16  ;;  %v609_v16 = vsel %vm608_vm5, 1, %v2133_v51  ;;  %v2475_v17 = vsel %vm469_vm8, %v2417_v56, %v2414_v53  ;;  %v2488_v53 = vsel %vm541_vm9, %v2429_v61, %v2426_v31 }
 0x527   :  { %1882 = vtanh.f32 %v570_v18  ;;  %v1800_v22 = vmul.f32 -1.442695, %v570_v18 }
 0x52d   :  { %v1883_v19 = vpop.eup %1882 }
 0x52e   :  { %593 = vrot.lane.b32.xlu0 %v1883_v19, %s2132_s0 }
 0x553   :  { %v639_v20 = vpop.f32.mrf.mxu3 }
 0x554   :  { %v642_v41 = vadd.f32 %v639_v20, %v2348_v39 }
 0x556   :  { %1884 = vtanh.f32 %v642_v41  ;;  %v1802_v52 = vmul.f32 -1.442695, %v642_v41 }
 0x557   :  { %1886 = vpow2.f32 %v1800_v22 }
 0x55c   :  { %v1885_v21 = vpop.eup %1884 }
 0x55d   :  { %665 = vrot.lane.b32.xlu1 %v1885_v21, %s2132_s0  ;;  %v1887_v25 = vpop.eup %1886  ;;  %v681_v21 = vsel %vm680_vm6, 1, %v2133_v51  ;;  %vm752_vm6 = vcmp.gt.s32.totalorder %v2356_v50, 3 }
 0x55e   :  { %v574_v26 = vadd.f32 1.0, %v1887_v25 }
 0x560   :  { %1888 = vrcp.f32 %v574_v26  ;;  %v586_v36 = vand.u32 2147483648, %v574_v26  ;;  %vm580_vm14 = vweird.f32 %v574_v26  ;;  %v584_v40 = vand.u32 2147483647, %v574_v26 }
 0x561   :  { %1890 = vpow2.f32 %v1802_v52 }
 0x562   :  { %v587_v43 = vor.u32 1.1754944e-38, %v586_v36  ;;  %vm585_vm0 = vcmp.eq.f32.partialorder %v584_v40, 8.507059e+37 }
 0x566   :  { %v1889_v27 = vpop.eup %1888 }
 0x567   :  { %v576_v29 = vmul.f32 %v1889_v27, %v574_v26  ;;  %vm581_vm10 = vweird.f32 %v1889_v27  ;;  %v1891_v54 = vpop.eup %1890 }
 0x568   :  { %vm582_vm15 = vmor %vm580_vm14, %vm581_vm10  ;;  %v646_v55 = vadd.f32 1.0, %v1891_v54 }
 0x569   :  { %v577_v30 = vsub.f32 1.0, %v576_v29 }
 0x56a   :  { %1892 = vrcp.f32 %v646_v55  ;;  %v658_v0 = vand.u32 2147483648, %v646_v55  ;;  %vm652_vm2 = vweird.f32 %v646_v55  ;;  %v656_v2 = vand.u32 2147483647, %v646_v55 }
 0x56b   :  { %v578_v33 = vmul.f32 %v1889_v27, %v577_v30 }
 0x56c   :  { %v659_v7 = vor.u32 1.1754944e-38, %v658_v0  ;;  %vm657_vm4 = vcmp.eq.f32.partialorder %v656_v2, 8.507059e+37 }
 0x56d   :  { %v579_v34 = vadd.f32 %v1889_v27, %v578_v33 }
 0x56f   :  { %v583_v39 = vsel %vm582_vm15, %v1889_v27, %v579_v34 }
 0x570   :  { %v588_v44 = vsel %vm585_vm0, %v587_v43, %v583_v39  ;;  %v1893_v57 = vpop.eup %1892 }
 0x571   :  { %v648_v58 = vmul.f32 %v1893_v57, %v646_v55  ;;  %vm653_vm1 = vweird.f32 %v1893_v57  ;;  %v591_v18 = vmul.f32 %v588_v44, %v2475_v17 }
 0x572   :  { %vm654_vm3 = vmor %vm652_vm2, %vm653_vm1 }
 0x573   :  { %v649_v59 = vsub.f32 1.0, %v648_v58 }
 0x575   :  { %v650_v60 = vmul.f32 %v1893_v57, %v649_v59 }
 0x577   :  { %v651_v62 = vadd.f32 %v1893_v57, %v650_v60 }
 0x579   :  { %v655_v6 = vsel %vm654_vm3, %v1893_v57, %v651_v62 }
 0x57a   :  { %v660_v45 = vsel %vm657_vm4, %v659_v7, %v655_v6 }
 0x57b   :  { %v663_v56 = vmul.f32 %v660_v45, %v2488_v53 }
 0x5a0   :  { %v594_v47 = vpop.permute.xlu0 %593 }
 0x5a1   :  { %v596_v48 = vmul.f32 %v594_v47, %v588_v44 }
 0x5a3   :  { %598 = vrot.lane.b32.xlu2 %v596_v48, %s2134_s1 }
 0x5cf   :  { %v666_v13 = vpop.permute.xlu1 %665 }
 0x5d0   :  { %v668_v49 = vmul.f32 %v666_v13, %v660_v45 }
 0x5d2   :  { %670 = vrot.lane.b32.xlu0 %v668_v49, %s2134_s1 }
 0x5da   :  { %611 = vperm.xlu0 %1843, %v609_v16  }
 0x5fd   :  { %v599_v19 = vpop.permute.xlu2 %598 }
 0x5fe   :  { %v2478_v20 = vadd.f32 %v599_v19, %v591_v18 }
 0x600   :  { %1894 = vtanh.f32 %v2478_v20 }
 0x606   :  { %v1895_v41 = vpop.eup %1894 }
 0x607   :  { %604 = vrot.lane.b32.xlu1 %v1895_v41, %s2132_s0 }
 0x60f   :  { %683 = vperm.xlu1 %1844, %v681_v21  }
 0x644   :  { %v671_v22 = vpop.permute.xlu0 %670 }
 0x645   :  { %v2491_v25 = vadd.f32 %v671_v22, %v663_v56 }
 0x647   :  { %1896 = vtanh.f32 %v2491_v25 }
 0x64c   :  { %v2495_v27 = vpop.permute.xlu0 %611 }
 0x64d   :  { %v1897_v26 = vpop.eup %1896  ;;  %vm613_vm7 = vcmp.eq.s32.totalorder %v2495_v27, 1 }
 0x64e   :  { %676 = vrot.lane.b32.xlu2 %v1897_v26, %s2132_s0 }
 0x679   :  { %v605_v29 = vpop.permute.xlu1 %604 }
 0x67a   :  { %v607_v30 = vmul.f32 %v605_v29, %v588_v44 }
 0x67c   :  { %v2501_v31 = vsel %vm613_vm7, %v607_v30, %v2439_v38 }
 0x67d   :  { %690 = vrot.lane.b32.xlu2 %v2501_v31, %s2134_s1 }
 0x681   :  { %v2505_v61 = vpop.permute.xlu1 %683 }
 0x682   :  { %vm685_vm10 = vcmp.eq.s32.totalorder %v2505_v61, 1 }
 0x6a8   :  { %v677_v33 = vpop.permute.xlu2 %676 }
 0x6a9   :  { %v679_v34 = vmul.f32 %v677_v33, %v660_v45 }
 0x6ab   :  { %v2511_v36 = vsel %vm685_vm10, %v679_v34, %v2449_v10  ;;  %v175_v10 = vpop.f32.mrf.mxu0 }
 0x6ac   :  { %762 = vrot.lane.b32.xlu0 %v2511_v36, %s2134_s1  ;;  %v176_v39 = vadd.f32 %v2336_v24, %v175_v10 }
 0x6d7   :  { %v691_v40 = vpop.permute.xlu2 %690 }
 0x6d8   :  { %1803 = vmatmul.msk.f32.vlgmr.msrb.gmra.mxu2 %vm263_vm13, %v691_v40 }
 0x6d9   :  { %982 = vmatpush.msrb.mxu2 %v2225_v1 }
 0x6db   :  { %983 = vmatpush.msrb.mxu2 %v2231_v3 }
 0x6dd   :  { %984 = vmatpush.msrb.mxu2 %v2239_v5 }
 0x6df   :  { %985 = vmatpush.msrb.mxu2 %v2246_v8 }
 0x71e   :  { %v763_v38 = vpop.permute.xlu0 %762 }
 0x71f   :  { %1805 = vmatmul.msk.f32.vlgmr.msrb.gmra.mxu3 %vm263_vm13, %v763_v38 }
 0x720   :  { %1048 = vmatpush.msrb.mxu3 %v2261_v11 }
 0x722   :  { %1049 = vmatpush.msrb.mxu3 %v2266_v12 }
 0x724   :  { %1050 = vmatpush.msrb.mxu3 %v2282_v14 }
 0x726   :  { %1051 = vmatpush.msrb.mxu3 %v2287_v15 }
 0x75b   :  { %v711_v43 = vpop.f32.mrf.mxu2 }
 0x75c   :  { %v714_v44 = vadd.f32 %v711_v43, %v176_v39  ;;  %v753_v43 = vsel %vm752_vm6, 1, %v2133_v51 }
 0x75e   :  { %1898 = vtanh.f32 %v714_v44  ;;  %v1804_v54 = vmul.f32 -1.442695, %v714_v44  ;;  %v2537_v44 = vsel %vm613_vm7, %v2478_v20, %v2475_v17  ;;  %v2550_v17 = vsel %vm685_vm10, %v2491_v25, %v2488_v53 }
 0x764   :  { %v1899_v47 = vpop.eup %1898 }
 0x765   :  { %737 = vrot.lane.b32.xlu1 %v1899_v47, %s2132_s0 }
 0x7a2   :  { %v783_v48 = vpop.f32.mrf.mxu3 }
 0x7a3   :  { %v786_v52 = vadd.f32 %v783_v48, %v2346_v37 }
 0x7a5   :  { %1900 = vtanh.f32 %v786_v52  ;;  %v1806_v18 = vmul.f32 -1.442695, %v786_v52 }
 0x7a6   :  { %1902 = vpow2.f32 %v1804_v54 }
 0x7ab   :  { %v1901_v55 = vpop.eup %1900 }
 0x7ac   :  { %809 = vrot.lane.b32.xlu2 %v1901_v55, %s2132_s0  ;;  %v1903_v57 = vpop.eup %1902 }
 0x7ad   :  { %v718_v58 = vadd.f32 1.0, %v1903_v57 }
 0x7af   :  { %1904 = vrcp.f32 %v718_v58  ;;  %v730_v6 = vand.u32 2147483648, %v718_v58  ;;  %vm724_vm15 = vweird.f32 %v718_v58  ;;  %v728_v7 = vand.u32 2147483647, %v718_v58 }
 0x7b0   :  { %1906 = vpow2.f32 %v1806_v18 }
 0x7b1   :  { %v731_v13 = vor.u32 1.1754944e-38, %v730_v6  ;;  %vm729_vm1 = vcmp.eq.f32.partialorder %v728_v7, 8.507059e+37 }
 0x7b5   :  { %v1905_v59 = vpop.eup %1904 }
 0x7b6   :  { %v720_v60 = vmul.f32 %v1905_v59, %v718_v58  ;;  %vm725_vm14 = vweird.f32 %v1905_v59  ;;  %v1907_v19 = vpop.eup %1906 }
 0x7b7   :  { %vm726_vm0 = vmor %vm724_vm15, %vm725_vm14  ;;  %v790_v41 = vadd.f32 1.0, %v1907_v19  ;;  %vm824_vm14 = vcmp.gt.s32.totalorder %v2356_v50, 4 }
 0x7b8   :  { %v721_v62 = vsub.f32 1.0, %v720_v60  ;;  %v825_v55 = vsel %vm824_vm14, 1, %v2133_v51 }
 0x7b9   :  { %1908 = vrcp.f32 %v790_v41  ;;  %v802_v30 = vand.u32 2147483648, %v790_v41  ;;  %vm796_vm3 = vweird.f32 %v790_v41  ;;  %v800_v33 = vand.u32 2147483647, %v790_v41 }
 0x7ba   :  { %v722_v0 = vmul.f32 %v1905_v59, %v721_v62 }
 0x7bb   :  { %v803_v40 = vor.u32 1.1754944e-38, %v802_v30  ;;  %vm801_vm5 = vcmp.eq.f32.partialorder %v800_v33, 8.507059e+37 }
 0x7bc   :  { %v723_v2 = vadd.f32 %v1905_v59, %v722_v0 }
 0x7be   :  { %v727_v37 = vsel %vm726_vm0, %v1905_v59, %v723_v2 }
 0x7bf   :  { %v732_v49 = vsel %vm729_vm1, %v731_v13, %v727_v37  ;;  %v1909_v21 = vpop.eup %1908 }
 0x7c0   :  { %v792_v56 = vmul.f32 %v1909_v21, %v790_v41  ;;  %vm797_vm2 = vweird.f32 %v1909_v21  ;;  %v735_v47 = vmul.f32 %v732_v49, %v2537_v44 }
 0x7c1   :  { %vm798_vm4 = vmor %vm796_vm3, %vm797_vm2 }
 0x7c2   :  { %v793_v22 = vsub.f32 1.0, %v792_v56 }
 0x7c4   :  { %v794_v26 = vmul.f32 %v1909_v21, %v793_v22 }
 0x7c6   :  { %v795_v29 = vadd.f32 %v1909_v21, %v794_v26 }
 0x7c8   :  { %v799_v34 = vsel %vm798_vm4, %v1909_v21, %v795_v29 }
 0x7c9   :  { %v804_v10 = vsel %vm801_vm5, %v803_v40, %v799_v34 }
 0x7ca   :  { %v807_v20 = vmul.f32 %v804_v10, %v2550_v17 }
 0x7d7   :  { %v738_v45 = vpop.permute.xlu1 %737 }
 0x7d8   :  { %v740_v16 = vmul.f32 %v738_v45, %v732_v49 }
 0x7da   :  { %742 = vrot.lane.b32.xlu0 %v740_v16, %s2134_s1 }
 0x806   :  { %v810_v38 = vpop.permute.xlu2 %809 }
 0x807   :  { %v812_v39 = vmul.f32 %v810_v38, %v804_v10 }
 0x809   :  { %814 = vrot.lane.b32.xlu1 %v812_v39, %s2134_s1 }
 0x811   :  { %755 = vperm.xlu1 %1844, %v753_v43  }
 0x84c   :  { %v743_v48 = vpop.permute.xlu0 %742 }
 0x84d   :  { %v2540_v52 = vadd.f32 %v743_v48, %v735_v47 }
 0x84f   :  { %1910 = vtanh.f32 %v2540_v52 }
 0x855   :  { %v1911_v54 = vpop.eup %1910 }
 0x856   :  { %748 = vrot.lane.b32.xlu2 %v1911_v54, %s2132_s0 }
 0x85e   :  { %827 = vperm.xlu2 %1845, %v825_v55  }
 0x87b   :  { %v815_v57 = vpop.permute.xlu1 %814 }
 0x87c   :  { %v2553_v58 = vadd.f32 %v815_v57, %v807_v20 }
 0x87e   :  { %1912 = vtanh.f32 %v2553_v58 }
 0x883   :  { %v2557_v50 = vpop.permute.xlu1 %755 }
 0x884   :  { %v1913_v59 = vpop.eup %1912  ;;  %vm757_vm15 = vcmp.eq.s32.totalorder %v2557_v50, 1 }
 0x885   :  { %820 = vrot.lane.b32.xlu0 %v1913_v59, %s2132_s0  ;;  %v2597_v57 = vsel %vm757_vm15, %v2540_v52, %v2537_v44 }
 0x8b0   :  { %v749_v51 = vpop.permute.xlu2 %748 }
 0x8b1   :  { %v751_v60 = vmul.f32 %v749_v51, %v732_v49 }
 0x8b3   :  { %v2563_v53 = vsel %vm757_vm15, %v751_v60, %v2501_v31 }
 0x8b4   :  { %834 = vrot.lane.b32.xlu0 %v2563_v53, %s2134_s1 }
 0x8b8   :  { %v2567_v25 = vpop.permute.xlu2 %827 }
 0x8b9   :  { %vm829_vm0 = vcmp.eq.s32.totalorder %v2567_v25, 1 }
 0x8f7   :  { %v821_v62 = vpop.permute.xlu0 %820 }
 0x8f8   :  { %v823_v0 = vmul.f32 %v821_v62, %v804_v10 }
 0x8fa   :  { %v2573_v2 = vsel %vm829_vm0, %v823_v0, %v2511_v36  ;;  %v178_v36 = vpop.f32.mrf.mxu0  ;;  %v2608_v0 = vsel %vm829_vm0, %v2553_v58, %v2550_v17 }
 0x8fb   :  { %900 = vrot.lane.b32.xlu1 %v2573_v2, %s2134_s1 }
 0x926   :  { %v835_v6 = vpop.permute.xlu0 %834 }
 0x927   :  { %1807 = vmatmul.msk.f32.vlgmr.msra.gmra.mxu2 %vm263_vm13, %v835_v6 }
 0x928   :  { %1114 = vmatpush.msra.mxu2 %v2225_v1  ;;  %v179_v1 = vadd.f32 %v2336_v24, %v178_v36 }
 0x92a   :  { %1115 = vmatpush.msra.mxu2 %v2231_v3 }
 0x92c   :  { %1116 = vmatpush.msra.mxu2 %v2239_v5 }
 0x92e   :  { %1117 = vmatpush.msra.mxu2 %v2246_v8 }
 0x96d   :  { %v901_v31 = vpop.permute.xlu1 %900 }
 0x96e   :  { %1809 = vmatmul.msk.f32.vlgmr.msra.gmra.mxu3 %vm263_vm13, %v901_v31 }
 0x96f   :  { %1180 = vmatpush.msra.mxu3 %v2261_v11 }
 0x971   :  { %1181 = vmatpush.msra.mxu3 %v2266_v12 }
 0x973   :  { %1182 = vmatpush.msra.mxu3 %v2282_v14 }
 0x975   :  { %1183 = vmatpush.msra.mxu3 %v2287_v15 }
 0x9aa   :  { %v855_v7 = vpop.f32.mrf.mxu2 }
 0x9ab   :  { %v858_v3 = vadd.f32 %v855_v7, %v179_v1 }
 0x9ad   :  { %1914 = vtanh.f32 %v858_v3  ;;  %v1808_v8 = vmul.f32 -1.442695, %v858_v3 }
 0x9af   :  { %1916 = vpow2.f32 %v1808_v8  ;;  %v2015_v8 = vld [vmem:[%s2862_s3 + $0x10] sm:$0xff] }
 0x9b3   :  { %v1915_v5 = vpop.eup %1914 }
 0x9b4   :  { %881 = vrot.lane.b32.xlu2 %v1915_v5, %s2132_s0 }
 0x9b5   :  { %v1917_v37 = vpop.eup %1916 }
 0x9b6   :  { %v862_v13 = vadd.f32 1.0, %v1917_v37  ;;  %v2017_v37 = vld [vmem:[%s2862_s3] sm:$0xff] }
 0x9b8   :  { %1918 = vrcp.f32 %v862_v13  ;;  %v874_v18 = vand.u32 2147483648, %v862_v13  ;;  %vm868_vm2 = vweird.f32 %v862_v13  ;;  %v872_v19 = vand.u32 2147483647, %v862_v13 }
 0x9ba   :  { %v875_v21 = vor.u32 1.1754944e-38, %v874_v18  ;;  %vm873_vm4 = vcmp.eq.f32.partialorder %v872_v19, 8.507059e+37 }
 0x9be   :  { %v1919_v14 = vpop.eup %1918 }
 0x9bf   :  { %v864_v45 = vmul.f32 %v1919_v14, %v862_v13  ;;  %vm869_vm1 = vweird.f32 %v1919_v14 }
 0x9c0   :  { %vm870_vm3 = vmor %vm868_vm2, %vm869_vm1 }
 0x9c1   :  { %v865_v24 = vsub.f32 1.0, %v864_v45  ;;  %v181_v45 = vpop.f32.mrf.mxu0 }
 0x9c3   :  { %v866_v49 = vmul.f32 %v1919_v14, %v865_v24  ;;  %v2658_v24 = vld [vmem:[%s2863_s4] ss:$0 sm:$0xff] }
 0x9c5   :  { %v867_v16 = vadd.f32 %v1919_v14, %v866_v49  ;;  %v182_v49 = vadd.f32 %v2658_v24, %v181_v45 }
 0x9c7   :  { %v871_v41 = vsel %vm870_vm3, %v1919_v14, %v867_v16  ;;  %v2020_v14 = vld [vmem:[%s2865_s6 + $0x8] sm:$0xff] }
 0x9c8   :  { %v876_v22 = vsel %vm873_vm4, %v875_v21, %v871_v41 }
 0x9c9   :  { %v879_v59 = vmul.f32 %v876_v22, %v2597_v57 }
 0x9f1   :  { %v921_v11 = vpop.f32.mrf.mxu3 }
 0x9f2   :  { %v924_v12 = vadd.f32 %v921_v11, %v2344_v35  ;;  %v2018_v11 = vld [vmem:[%s2865_s6 + $0x18] sm:$0xff] }
 0x9f4   :  { %1920 = vtanh.f32 %v924_v12  ;;  %v1810_v26 = vmul.f32 -1.442695, %v924_v12  ;;  %v2019_v12 = vld [vmem:[%s2865_s6 + $0x10] sm:$0xff] }
 0x9f6   :  { %1922 = vpow2.f32 %v1810_v26 }
 0x9fa   :  { %v1921_v15 = vpop.eup %1920 }
 0x9fb   :  { %947 = vrot.lane.b32.xlu0 %v1921_v15, %s2132_s0  ;;  %v2021_v15 = vld [vmem:[%s2865_s6] sm:$0xff] }
 0x9fc   :  { %v1923_v29 = vpop.eup %1922 }
 0x9fd   :  { %v928_v30 = vadd.f32 1.0, %v1923_v29 }
 0x9ff   :  { %1924 = vrcp.f32 %v928_v30  ;;  %v940_v39 = vand.u32 2147483648, %v928_v30  ;;  %vm934_vm6 = vweird.f32 %v928_v30  ;;  %v938_v43 = vand.u32 2147483647, %v928_v30 }
 0xa01   :  { %v941_v48 = vor.u32 1.1754944e-38, %v940_v39  ;;  %vm939_vm1 = vcmp.eq.f32.partialorder %v938_v43, 8.507059e+37 }
 0xa05   :  { %v1925_v33 = vpop.eup %1924 }
 0xa06   :  { %v930_v34 = vmul.f32 %v1925_v33, %v928_v30  ;;  %vm935_vm5 = vweird.f32 %v1925_v33 }
 0xa07   :  { %vm936_vm14 = vmor %vm934_vm6, %vm935_vm5 }
 0xa08   :  { %v931_v40 = vsub.f32 1.0, %v930_v34 }
 0xa0a   :  { %v932_v38 = vmul.f32 %v1925_v33, %v931_v40 }
 0xa0c   :  { %v933_v10 = vadd.f32 %v1925_v33, %v932_v38 }
 0xa0e   :  { %v882_v56 = vpop.permute.xlu2 %881  ;;  %v937_v47 = vsel %vm936_vm14, %v1925_v33, %v933_v10 }
 0xa0f   :  { %v884_v35 = vmul.f32 %v882_v56, %v876_v22  ;;  %v942_v54 = vsel %vm939_vm1, %v941_v48, %v937_v47 }
 0xa10   :  { %v945_v6 = vmul.f32 %v942_v54, %v2608_v0 }
 0xa11   :  { %886 = vrot.lane.b32.xlu1 %v884_v35, %s2134_s1 }
 0xa6d   :  { %v948_v55 = vpop.permute.xlu0 %947 }
 0xa6e   :  { %v950_v20 = vmul.f32 %v948_v55, %v942_v54 }
 0xa70   :  { %952 = vrot.lane.b32.xlu2 %v950_v20, %s2134_s1 }
 0xa83   :  { %v887_v51 = vpop.permute.xlu1 %886 }
 0xa84   :  { %v2600_v60 = vadd.f32 %v887_v51, %v879_v59 }
 0xa86   :  { %1926 = vtanh.f32 %v2600_v60 }
 0xa8c   :  { %v1927_v62 = vpop.eup %1926 }
 0xa8d   :  { %892 = vrot.lane.b32.xlu0 %v1927_v62, %s2132_s0 }
 0xaca   :  { %v953_v44 = vpop.permute.xlu2 %952 }
 0xacb   :  { %v2611_v52 = vadd.f32 %v953_v44, %v945_v6 }
 0xacd   :  { %1928 = vtanh.f32 %v2611_v52 }
 0xad3   :  { %v1929_v31 = vpop.eup %1928 }
 0xad4   :  { %958 = vrot.lane.b32.xlu1 %v1929_v31, %s2132_s0 }
 0xaff   :  { %v893_v36 = vpop.permute.xlu0 %892 }
 0xb00   :  { %v895_v1 = vmul.f32 %v893_v36, %v876_v22 }
 0xb02   :  { %v2618_v7 = vsel %vm829_vm0, %v895_v1, %v2563_v53  ;;  %v2014_v53 = vld [vmem:[%s2862_s3 + $0x18] sm:$0xff] }
 0xb03   :  { %966 = vrot.lane.b32.xlu2 %v2618_v7, %s2134_s1 }
 0xb46   :  { %v959_v17 = vpop.permute.xlu1 %958 }
 0xb47   :  { %v961_v58 = vmul.f32 %v959_v17, %v942_v54 }
 0xb49   :  { %v2625_v3 = vsel %vm757_vm15, %v961_v58, %v2573_v2  ;;  %v2016_v2 = vld [vmem:[%s2862_s3 + $0x8] sm:$0xff] }
 0xb4a   :  { %1032 = vrot.lane.b32.xlu0 %v2625_v3, %s2134_s1 }
 0xb5d   :  { %v967_v5 = vpop.permute.xlu2 %966 }
 0xb5e   :  { %1811 = vmatmul.msk.f32.vlgmr.msrb.gmra.mxu2 %vm263_vm13, %v967_v5 }
 0xb5f   :  { %1246 = vmatpush.msrb.mxu2 %v2014_v53 }
 0xb61   :  { %1247 = vmatpush.msrb.mxu2 %v2015_v8  ;;  %v2670_v8 = vsel %vm829_vm0, %v2600_v60, %v2597_v57 }
 0xb63   :  { %1248 = vmatpush.msrb.mxu2 %v2016_v2 }
 0xb65   :  { %1249 = vmatpush.msrb.mxu2 %v2017_v37 }
 0xbbc   :  { %v1033_v13 = vpop.permute.xlu0 %1032 }
 0xbbd   :  { %1813 = vmatmul.msk.f32.vlgmr.msrb.gmra.mxu3 %vm263_vm13, %v1033_v13 }
 0xbbe   :  { %1311 = vmatpush.msrb.mxu3 %v2018_v11 }
 0xbc0   :  { %1312 = vmatpush.msrb.mxu3 %v2019_v12  ;;  %v2681_v12 = vsel %vm757_vm15, %v2611_v52, %v2608_v0 }
 0xbc2   :  { %1313 = vmatpush.msrb.mxu3 %v2020_v14 }
 0xbc4   :  { %1314 = vmatpush.msrb.mxu3 %v2021_v15 }
 0xbe1   :  { %v987_v16 = vpop.f32.mrf.mxu2 }
 0xbe2   :  { %v990_v18 = vadd.f32 %v987_v16, %v182_v49 }
 0xbe4   :  { %1930 = vtanh.f32 %v990_v18  ;;  %v1812_v41 = vmul.f32 -1.442695, %v990_v18 }
 0xbe6   :  { %1932 = vpow2.f32 %v1812_v41 }
 0xbea   :  { %v1931_v19 = vpop.eup %1930 }
 0xbeb   :  { %1013 = vrot.lane.b32.xlu1 %v1931_v19, %s2132_s0 }
 0xbec   :  { %v1933_v21 = vpop.eup %1932 }
 0xbed   :  { %v994_v56 = vadd.f32 1.0, %v1933_v21 }
 0xbef   :  { %1934 = vrcp.f32 %v994_v56  ;;  %v1006_v38 = vand.u32 2147483648, %v994_v56  ;;  %vm1000_vm3 = vweird.f32 %v994_v56  ;;  %v1004_v10 = vand.u32 2147483647, %v994_v56 }
 0xbf1   :  { %v1007_v43 = vor.u32 1.1754944e-38, %v1006_v38  ;;  %vm1005_vm5 = vcmp.eq.f32.partialorder %v1004_v10, 8.507059e+37 }
 0xbf5   :  { %v1935_v26 = vpop.eup %1934 }
 0xbf6   :  { %v996_v30 = vmul.f32 %v1935_v26, %v994_v56  ;;  %vm1001_vm2 = vweird.f32 %v1935_v26 }
 0xbf7   :  { %vm1002_vm4 = vmor %vm1000_vm3, %vm1001_vm2 }
 0xbf8   :  { %v997_v33 = vsub.f32 1.0, %v996_v30 }
 0xbfa   :  { %v998_v34 = vmul.f32 %v1935_v26, %v997_v33 }
 0xbfc   :  { %v999_v40 = vadd.f32 %v1935_v26, %v998_v34 }
 0xbfe   :  { %v1003_v39 = vsel %vm1002_vm4, %v1935_v26, %v999_v40 }
 0xbff   :  { %v1008_v48 = vsel %vm1005_vm5, %v1007_v43, %v1003_v39 }
 0xc00   :  { %v1011_v2 = vmul.f32 %v1008_v48, %v2670_v8 }
 0xc40   :  { %v1053_v22 = vpop.f32.mrf.mxu3 }
 0xc41   :  { %v1056_v35 = vadd.f32 %v1053_v22, %v2341_v32 }
 0xc43   :  { %1936 = vtanh.f32 %v1056_v35  ;;  %v1814_v54 = vmul.f32 -1.442695, %v1056_v35 }
 0xc45   :  { %1938 = vpow2.f32 %v1814_v54 }
 0xc49   :  { %v1937_v29 = vpop.eup %1936 }
 0xc4a   :  { %1079 = vrot.lane.b32.xlu2 %v1937_v29, %s2132_s0 }
 0xc4b   :  { %v1939_v55 = vpop.eup %1938 }
 0xc4c   :  { %v1060_v20 = vadd.f32 1.0, %v1939_v55 }
 0xc4e   :  { %1940 = vrcp.f32 %v1060_v20  ;;  %v1072_v31 = vand.u32 2147483648, %v1060_v20  ;;  %vm1066_vm14 = vweird.f32 %v1060_v20  ;;  %v1070_v36 = vand.u32 2147483647, %v1060_v20 }
 0xc50   :  { %v1073_v17 = vor.u32 1.1754944e-38, %v1072_v31  ;;  %vm1071_vm2 = vcmp.eq.f32.partialorder %v1070_v36, 8.507059e+37 }
 0xc54   :  { %v1941_v59 = vpop.eup %1940 }
 0xc55   :  { %v1062_v51 = vmul.f32 %v1941_v59, %v1060_v20  ;;  %vm1067_vm6 = vweird.f32 %v1941_v59 }
 0xc56   :  { %vm1068_vm1 = vmor %vm1066_vm14, %vm1067_vm6 }
 0xc57   :  { %v1063_v62 = vsub.f32 1.0, %v1062_v51 }
 0xc59   :  { %v1064_v6 = vmul.f32 %v1941_v59, %v1063_v62 }
 0xc5b   :  { %v1065_v44 = vadd.f32 %v1941_v59, %v1064_v6 }
 0xc5d   :  { %v1014_v47 = vpop.permute.xlu1 %1013  ;;  %v1069_v1 = vsel %vm1068_vm1, %v1941_v59, %v1065_v44 }
 0xc5e   :  { %v1016_v32 = vmul.f32 %v1014_v47, %v1008_v48  ;;  %v1074_v5 = vsel %vm1071_vm2, %v1073_v17, %v1069_v1 }
 0xc5f   :  { %v1077_v25 = vmul.f32 %v1074_v5, %v2681_v12 }
 0xc60   :  { %1018 = vrot.lane.b32.xlu0 %v1016_v32, %s2134_s1 }
 0xca4   :  { %v1080_v58 = vpop.permute.xlu2 %1079 }
 0xca5   :  { %v1082_v53 = vmul.f32 %v1080_v58, %v1074_v5 }
 0xca7   :  { %1084 = vrot.lane.b32.xlu1 %v1082_v53, %s2134_s1 }
 0xcd2   :  { %v1019_v37 = vpop.permute.xlu0 %1018 }
 0xcd3   :  { %v2673_v13 = vadd.f32 %v1019_v37, %v1011_v2 }
 0xcd5   :  { %1942 = vtanh.f32 %v2673_v13  ;;  %v2714_v37 = vsel %vm685_vm10, %v2673_v13, %v2670_v8 }
 0xcdb   :  { %v1943_v11 = vpop.eup %1942 }
 0xcdc   :  { %1024 = vrot.lane.b32.xlu2 %v1943_v11, %s2132_s0 }
 0xd19   :  { %v1085_v57 = vpop.permute.xlu1 %1084 }
 0xd1a   :  { %v2684_v60 = vadd.f32 %v1085_v57, %v1077_v25 }
 0xd1c   :  { %1944 = vtanh.f32 %v2684_v60 }
 0xd22   :  { %v1945_v14 = vpop.eup %1944 }
 0xd23   :  { %1090 = vrot.lane.b32.xlu0 %v1945_v14, %s2132_s0 }
 0xd36   :  { %v1025_v15 = vpop.permute.xlu2 %1024 }
 0xd37   :  { %v1027_v45 = vmul.f32 %v1025_v15, %v1008_v48  ;;  %v2725_v15 = vsel %vm613_vm7, %v2684_v60, %v2681_v12 }
 0xd39   :  { %v2691_v49 = vsel %vm685_vm10, %v1027_v45, %v2618_v7  ;;  %v184_v7 = vpop.f32.mrf.mxu0 }
 0xd3a   :  { %1098 = vrot.lane.b32.xlu1 %v2691_v49, %s2134_s1  ;;  %v185_v19 = vadd.f32 %v2658_v24, %v184_v7 }
 0xd95   :  { %v1091_v50 = vpop.permute.xlu0 %1090 }
 0xd96   :  { %v1093_v0 = vmul.f32 %v1091_v50, %v1074_v5 }
 0xd98   :  { %v2698_v52 = vsel %vm613_vm7, %v1093_v0, %v2625_v3 }
 0xd99   :  { %1164 = vrot.lane.b32.xlu2 %v2698_v52, %s2134_s1 }
 0xdac   :  { %v1099_v16 = vpop.permute.xlu1 %1098 }
 0xdad   :  { %1815 = vmatmul.msk.f32.vlgmr.msra.gmra.mxu2 %vm263_vm13, %v1099_v16 }
 0xdf3   :  { %v1165_v18 = vpop.permute.xlu2 %1164 }
 0xdf4   :  { %1817 = vmatmul.msk.f32.vlgmr.msra.gmra.mxu3 %vm263_vm13, %v1165_v18 }
 0xe30   :  { %v1119_v41 = vpop.f32.mrf.mxu2 }
 0xe31   :  { %v1122_v21 = vadd.f32 %v1119_v41, %v185_v19 }
 0xe33   :  { %1946 = vtanh.f32 %v1122_v21  ;;  %v1816_v35 = vmul.f32 -1.442695, %v1122_v21 }
 0xe39   :  { %v1947_v56 = vpop.eup %1946 }
 0xe3a   :  { %1145 = vrot.lane.b32.xlu0 %v1947_v56, %s2132_s0 }
 0xe77   :  { %v1185_v3 = vpop.f32.mrf.mxu3 }
 0xe78   :  { %v1188_v22 = vadd.f32 %v1185_v3, %v2339_v28 }
 0xe7a   :  { %1948 = vtanh.f32 %v1188_v22  ;;  %v1818_v55 = vmul.f32 -1.442695, %v1188_v22 }
 0xe7b   :  { %1950 = vpow2.f32 %v1816_v35 }
 0xe80   :  { %v1949_v26 = vpop.eup %1948 }
 0xe81   :  { %1211 = vrot.lane.b32.xlu1 %v1949_v26, %s2132_s0  ;;  %v1951_v29 = vpop.eup %1950 }
 0xe82   :  { %v1126_v30 = vadd.f32 1.0, %v1951_v29 }
 0xe84   :  { %1952 = vrcp.f32 %v1126_v30  ;;  %v1138_v39 = vand.u32 2147483648, %v1126_v30  ;;  %vm1132_vm0 = vweird.f32 %v1126_v30  ;;  %v1136_v43 = vand.u32 2147483647, %v1126_v30 }
 0xe85   :  { %1954 = vpow2.f32 %v1818_v55 }
 0xe86   :  { %v1139_v47 = vor.u32 1.1754944e-38, %v1138_v39  ;;  %vm1137_vm4 = vcmp.eq.f32.partialorder %v1136_v43, 8.507059e+37 }
 0xe8a   :  { %v1953_v33 = vpop.eup %1952 }
 0xe8b   :  { %v1128_v34 = vmul.f32 %v1953_v33, %v1126_v30  ;;  %vm1133_vm15 = vweird.f32 %v1953_v33  ;;  %v1955_v20 = vpop.eup %1954 }
 0xe8c   :  { %vm1134_vm3 = vmor %vm1132_vm0, %vm1133_vm15  ;;  %v1192_v59 = vadd.f32 1.0, %v1955_v20 }
 0xe8d   :  { %v1129_v40 = vsub.f32 1.0, %v1128_v34 }
 0xe8e   :  { %1956 = vrcp.f32 %v1192_v59  ;;  %v1204_v36 = vand.u32 2147483648, %v1192_v59  ;;  %vm1198_vm6 = vweird.f32 %v1192_v59  ;;  %v1202_v1 = vand.u32 2147483647, %v1192_v59 }
 0xe8f   :  { %v1130_v38 = vmul.f32 %v1953_v33, %v1129_v40 }
 0xe90   :  { %v1205_v58 = vor.u32 1.1754944e-38, %v1204_v36  ;;  %vm1203_vm1 = vcmp.eq.f32.partialorder %v1202_v1, 8.507059e+37 }
 0xe91   :  { %v1131_v10 = vadd.f32 %v1953_v33, %v1130_v38 }
 0xe93   :  { %v1135_v28 = vsel %vm1134_vm3, %v1953_v33, %v1131_v10 }
 0xe94   :  { %v1140_v48 = vsel %vm1137_vm4, %v1139_v47, %v1135_v28  ;;  %v1957_v51 = vpop.eup %1956 }
 0xe95   :  { %v1194_v62 = vmul.f32 %v1957_v51, %v1192_v59  ;;  %vm1199_vm5 = vweird.f32 %v1957_v51  ;;  %v1143_v11 = vmul.f32 %v1140_v48, %v2714_v37 }
 0xe96   :  { %vm1200_vm14 = vmor %vm1198_vm6, %vm1199_vm5 }
 0xe97   :  { %v1195_v6 = vsub.f32 1.0, %v1194_v62 }
 0xe99   :  { %v1196_v44 = vmul.f32 %v1957_v51, %v1195_v6 }
 0xe9b   :  { %v1197_v31 = vadd.f32 %v1957_v51, %v1196_v44 }
 0xe9d   :  { %v1201_v17 = vsel %vm1200_vm14, %v1957_v51, %v1197_v31 }
 0xe9e   :  { %v1206_v53 = vsel %vm1203_vm1, %v1205_v58, %v1201_v17 }
 0xe9f   :  { %v1209_v61 = vmul.f32 %v1206_v53, %v2725_v15 }
 0xeac   :  { %v1146_v32 = vpop.permute.xlu0 %1145 }
 0xead   :  { %v1148_v54 = vmul.f32 %v1146_v32, %v1140_v48 }
 0xeaf   :  { %1150 = vrot.lane.b32.xlu2 %v1148_v54, %s2134_s1 }
 0xef3   :  { %v1212_v5 = vpop.permute.xlu1 %1211 }
 0xef4   :  { %v1214_v2 = vmul.f32 %v1212_v5, %v1206_v53 }
 0xef6   :  { %1216 = vrot.lane.b32.xlu0 %v1214_v2, %s2134_s1 }
 0xf09   :  { %v1151_v25 = vpop.permute.xlu2 %1150 }
 0xf0a   :  { %v2717_v57 = vadd.f32 %v1151_v25, %v1143_v11 }
 0xf0c   :  { %1958 = vtanh.f32 %v2717_v57  ;;  %v1161_v5 = vsel %vm541_vm9, %v2717_v57, %v2714_v37 }
 0xf12   :  { %v1959_v14 = vpop.eup %1958 }
 0xf13   :  { %1156 = vrot.lane.b32.xlu1 %v1959_v14, %s2132_s0 }
 0xf68   :  { %v1217_v8 = vpop.permute.xlu0 %1216 }
 0xf69   :  { %v2728_v13 = vadd.f32 %v1217_v8, %v1209_v61 }
 0xf6b   :  { %1960 = vtanh.f32 %v2728_v13  ;;  %v1227_v14 = vsel %vm469_vm8, %v2728_v13, %v2725_v15  ;;  %v1360_v15 = vld [vmem:[%s2867_s8 + $0x10] sm:$0xff]  ;;  %v1359_v13 = vld [vmem:[%s2867_s8 + $0x8] sm:$0xff] }
 0xf6c   :  { %1409 = vmatpush.msrb.mxu1 %v1360_v15 }
 0xf6e   :  { %1410 = vmatpush.msrb.mxu1 %v1359_v13 }
 0xf70   :  { %1411 = vmatpush.msrb.mxu1 %v1358_v46 }
 0xf71   :  { %v1961_v45 = vpop.eup %1960 }
 0xf72   :  { %1222 = vrot.lane.b32.xlu2 %v1961_v45, %s2132_s0 }
 0xf85   :  { %v1157_v50 = vpop.permute.xlu1 %1156 }
 0xf86   :  { %v1159_v0 = vmul.f32 %v1157_v50, %v1140_v48 }
 0xf88   :  { %v2735_v16 = vsel %vm541_vm9, %v1159_v0, %v2691_v49  ;;  %v187_v49 = vpop.f32.mrf.mxu0  ;;  %v1365_v0 = vld [vmem:[#allocation8 + $0x18] sm:$0xff] }
 0xf89   :  { %1230 = vrot.lane.b32.xlu0 %v2735_v16, %s2134_s1  ;;  %v188_v19 = vadd.f32 %v2658_v24, %v187_v49  ;;  %1383 = vmatpush.msrb.mxu0 %v1365_v0  ;;  %v1362_v49 = vld [vmem:[#allocation8] sm:$0xff] }
 0xfcc   :  { %v1223_v27 = vpop.permute.xlu2 %1222 }
 0xfcd   :  { %v1225_v12 = vmul.f32 %v1223_v27, %v1206_v53 }
 0xfcf   :  { %v2742_v60 = vsel %vm469_vm8, %v1225_v12, %v2698_v52 }
 0xfd0   :  { %1295 = vrot.lane.b32.xlu1 %v2742_v60, %s2134_s1 }
 0xffb   :  { %v1231_v18 = vpop.permute.xlu0 %1230 }
 0xffc   :  { %1819 = vmatmul.msk.f32.vlgmr.msrb.gmra.mxu2 %vm263_vm13, %v1231_v18  ;;  %v1364_v18 = vld [vmem:[#allocation8 + $0x10] sm:$0xff] }
 0xffd   :  { %1384 = vmatpush.msrb.mxu0 %v1364_v18 }
0x1042   :  { %v1296_v7 = vpop.permute.xlu1 %1295 }
0x1043   :  { %1821 = vmatmul.msk.f32.vlgmr.msrb.gmra.mxu3 %vm263_vm13, %v1296_v7  ;;  %v1363_v7 = vld [vmem:[#allocation8 + $0x8] sm:$0xff] }
0x1044   :  { %1385 = vmatpush.msrb.mxu0 %v1363_v7 }
0x1046   :  { %1386 = vmatpush.msrb.mxu0 %v1362_v49 }
0x107f   :  { %v1251_v41 = vpop.f32.mrf.mxu2 }
0x1080   :  { %v1254_v21 = vadd.f32 %v1251_v41, %v188_v19  ;;  %v1424_v41 = vld [vmem:[#allocation9 + $0x18] sm:$0xff] }
0x1081   :  { %1449 = vmatpush.msra.mxu2 %v1424_v41  ;;  %1524 = vmatpush.msra.mxu3 %v1424_v41 }
0x1082   :  { %1962 = vtanh.f32 %v1254_v21  ;;  %v1820_v52 = vmul.f32 -1.442695, %v1254_v21  ;;  %v1423_v21 = vld [vmem:[#allocation9 + $0x10] sm:$0xff]  ;;  %1599 = vmatpush.msra.mxu0 %v1424_v41  ;;  %1674 = vmatpush.msra.mxu1 %v1424_v41 }
0x1083   :  { %1450 = vmatpush.msra.mxu2 %v1423_v21  ;;  %1525 = vmatpush.msra.mxu3 %v1423_v21 }
0x1084   :  { %1964 = vpow2.f32 %v1820_v52  ;;  %1600 = vmatpush.msra.mxu0 %v1423_v21  ;;  %1675 = vmatpush.msra.mxu1 %v1423_v21  ;;  %v1425_v52 = vlaneseq }
0x1088   :  { %v1963_v56 = vpop.eup %1962 }
0x1089   :  { %1277 = vrot.lane.b32.xlu2 %v1963_v56, %s2132_s0  ;;  %v1422_v56 = vld [vmem:[#allocation9 + $0x8] sm:$0xff] }
0x108a   :  { %v1965_v3 = vpop.eup %1964  ;;  %1451 = vmatpush.msra.mxu2 %v1422_v56  ;;  %1526 = vmatpush.msra.mxu3 %v1422_v56 }
0x108b   :  { %v1258_v22 = vadd.f32 1.0, %v1965_v3  ;;  %1601 = vmatpush.msra.mxu0 %v1422_v56  ;;  %1676 = vmatpush.msra.mxu1 %v1422_v56  ;;  %v2787_v3 = vshrl.u32 %v1425_v52, 7 }
0x108c   :  { %1452 = vmatpush.msra.mxu2 %v1421_v42  ;;  %1527 = vmatpush.msra.mxu3 %v1421_v42 }
0x108d   :  { %1966 = vrcp.f32 %v1258_v22  ;;  %v1270_v38 = vand.u32 2147483648, %v1258_v22  ;;  %vm1264_vm10 = vweird.f32 %v1258_v22  ;;  %v1268_v10 = vand.u32 2147483647, %v1258_v22  ;;  %1453 = vmatmul.f32.vlgmr.msra.gmra.mxu2 %v2131_v9  ;;  %1602 = vmatpush.msra.mxu0 %v1421_v42 }
0x108e   :  { %1677 = vmatpush.msra.mxu1 %v1421_v42  ;;  %vm1497_vm14 = vcmp.eq.s32.totalorder %v2787_v3, 1 }
0x108f   :  { %v1271_v43 = vor.u32 1.1754944e-38, %v1270_v38  ;;  %vm1269_vm15 = vcmp.eq.f32.partialorder %v1268_v10, 8.507059e+37 }
0x1093   :  { %v1967_v29 = vpop.eup %1966 }
0x1094   :  { %v1260_v33 = vmul.f32 %v1967_v29, %v1258_v22  ;;  %vm1265_vm7 = vweird.f32 %v1967_v29  ;;  %v1848_v22 = vld [vmem:[%s2870_s11] ss:$0 sm:$0xff] }
0x1095   :  { %vm1266_vm2 = vmor %vm1264_vm10, %vm1265_vm7 }
0x1096   :  { %v1261_v24 = vsub.f32 1.0, %v1260_v33 }
0x1098   :  { %v1262_v34 = vmul.f32 %v1967_v29, %v1261_v24 }
0x109a   :  { %v1263_v40 = vadd.f32 %v1967_v29, %v1262_v34 }
0x109c   :  { %v1267_v39 = vsel %vm1266_vm2, %v1967_v29, %v1263_v40 }
0x109d   :  { %v1272_v47 = vsel %vm1269_vm15, %v1271_v43, %v1267_v39  ;;  %vm1572_vm15 = vcmp.eq.s32.totalorder %v2787_v3, 2 }
0x109e   :  { %v1275_v53 = vmul.f32 %v1272_v47, %v1161_v5 }
0x10c6   :  { %v1316_v35 = vpop.f32.mrf.mxu3 }
0x10c7   :  { %v1319_v26 = vadd.f32 %v1316_v35, %v2331_v23 }
0x10c9   :  { %1968 = vtanh.f32 %v1319_v26  ;;  %v1822_v48 = vmul.f32 -1.442695, %v1319_v26 }
0x10cb   :  { %1970 = vpow2.f32 %v1822_v48 }
0x10cf   :  { %v1969_v30 = vpop.eup %1968 }
0x10d0   :  { %1342 = vrot.lane.b32.xlu0 %v1969_v30, %s2132_s0 }
0x10d1   :  { %v1971_v32 = vpop.eup %1970 }
0x10d2   :  { %v1323_v54 = vadd.f32 1.0, %v1971_v32 }
0x10d4   :  { %1972 = vrcp.f32 %v1323_v54  ;;  %v1335_v6 = vand.u32 2147483648, %v1323_v54  ;;  %vm1329_vm3 = vweird.f32 %v1323_v54  ;;  %v1333_v44 = vand.u32 2147483647, %v1323_v54 }
0x10d6   :  { %v1336_v36 = vor.u32 1.1754944e-38, %v1335_v6  ;;  %vm1334_vm5 = vcmp.eq.f32.partialorder %v1333_v44, 8.507059e+37 }
0x10da   :  { %v1973_v55 = vpop.eup %1972 }
0x10db   :  { %v1325_v20 = vmul.f32 %v1973_v55, %v1323_v54  ;;  %vm1330_vm0 = vweird.f32 %v1973_v55 }
0x10dc   :  { %vm1331_vm4 = vmor %vm1329_vm3, %vm1330_vm0 }
0x10dd   :  { %v1326_v59 = vsub.f32 1.0, %v1325_v20 }
0x10df   :  { %v1327_v51 = vmul.f32 %v1973_v55, %v1326_v59 }
0x10e1   :  { %v1328_v62 = vadd.f32 %v1973_v55, %v1327_v51 }
0x10e3   :  { %v1278_v28 = vpop.permute.xlu2 %1277  ;;  %v1332_v31 = vsel %vm1331_vm4, %v1973_v55, %v1328_v62 }
0x10e4   :  { %v1280_v23 = vmul.f32 %v1278_v28, %v1272_v47  ;;  %v1337_v1 = vsel %vm1334_vm5, %v1336_v36, %v1332_v31 }
0x10e5   :  { %v1340_v61 = vmul.f32 %v1337_v1, %v1227_v14 }
0x10e6   :  { %1282 = vrot.lane.b32.xlu1 %v1280_v23, %s2134_s1 }
0x1110   :  { %v1454_v10 = vpop.f32.mrf.mxu2 }
0x1142   :  { %v1343_v17 = vpop.permute.xlu0 %1342 }
0x1143   :  { %v1345_v58 = vmul.f32 %v1343_v17, %v1337_v1 }
0x1145   :  { %1347 = vrot.lane.b32.xlu2 %v1345_v58, %s2134_s1 }
0x1158   :  { %v1283_v2 = vpop.permute.xlu1 %1282 }
0x1159   :  { %v1285_v11 = vadd.f32 %v1283_v2, %v1275_v53 }
0x115b   :  { %1974 = vtanh.f32 %v1285_v11 }
0x1161   :  { %v1975_v25 = vpop.eup %1974 }
0x1162   :  { %1288 = vrot.lane.b32.xlu0 %v1975_v25, %s2132_s0 }
0x119f   :  { %v1348_v8 = vpop.permute.xlu2 %1347 }
0x11a0   :  { %v1350_v45 = vadd.f32 %v1348_v8, %v1340_v61 }
0x11a2   :  { %1976 = vtanh.f32 %v1350_v45 }
0x11a8   :  { %v1977_v50 = vpop.eup %1976 }
0x11a9   :  { %1353 = vrot.lane.b32.xlu1 %v1977_v50, %s2132_s0 }
0x11d4   :  { %v1289_v4 = vpop.permute.xlu0 %1288 }
0x11d5   :  { %v1291_v37 = vmul.f32 %v1289_v4, %v1272_v47 }
0x11d7   :  { %v1292_v57 = vsel %vm397_vm12, %v1291_v37, %v2735_v16 }
0x11d8   :  { %1392 = vrot.lane.b32.xlu0 %v1292_v57, %s2134_s1 }
0x121b   :  { %v1354_v16 = vpop.permute.xlu1 %1353 }
0x121c   :  { %v1356_v27 = vmul.f32 %v1354_v16, %v1337_v1 }
0x121e   :  { %v1357_v12 = vsel %vm330_vm11, %v1356_v27, %v2742_v60  ;;  %vm1427_vm11 = vcmp.eq.s32.totalorder %v2787_v3, 0 }
0x121f   :  { %1367 = vrot.lane.b32.xlu2 %v1357_v12, %s2134_s1 }
0x124a   :  { %v1393_v19 = vpop.permute.xlu0 %1392 }
0x124b   :  { %1824 = vmatmul.msk.f32.vlgmr.msrb.gmra.mxu1 %vm263_vm13, %v1393_v19 }
0x1279   :  { %v1368_v60 = vpop.permute.xlu2 %1367 }
0x127a   :  { %1823 = vmatmul.msk.f32.vlgmr.msrb.gmra.mxu0 %vm263_vm13, %v1368_v60 }
0x12c8   :  { %v1413_v35 = vpop.f32.mrf.mxu1 }
0x12f7   :  { %v1388_v26 = vpop.f32.mrf.mxu0 }
0x12f8   :  { %v1414_v29 = vadd.f32 %v1413_v35, %v1388_v26 }
0x12fa   :  { %v2793_v30 = vadd.f32 %v1848_v22, %v1414_v29 }
0x12fc   :  { %v1430_v9 = vsel %vm1427_vm11, %v2793_v30, 0.0  ;;  %v1500_v14 = vsel %vm1497_vm14, %v2793_v30, 0.0 }
0x12fd   :  { %v1431_v33 = vrot.slane %v1430_v9, 4  ;;  %v1501_v61 = vrot.slane %v1500_v14, 4 }
0x12ff   :  { %v1432_v24 = vadd.f32 %v1431_v33, %v1430_v9  ;;  %v1502_v8 = vadd.f32 %v1501_v61, %v1500_v14 }
0x1301   :  { %v1433_v34 = vrot.slane %v1432_v24, 2  ;;  %v1503_v45 = vrot.slane %v1502_v8, 2 }
0x1303   :  { %v1434_v40 = vadd.f32 %v1433_v34, %v1432_v24  ;;  %v1504_v50 = vadd.f32 %v1503_v45, %v1502_v8 }
0x1305   :  { %v1435_v38 = vrot.slane %v1434_v40, 1  ;;  %v1505_v4 = vrot.slane %v1504_v50, 1 }
0x1307   :  { %v1436_v39 = vadd.f32 %v1435_v38, %v1434_v40  ;;  %v1506_v37 = vadd.f32 %v1505_v4, %v1504_v50 }
0x1309   :  { %v1457_v43 = vadd.f32 %v1454_v10, %v1436_v39  ;;  %v1575_v10 = vsel %vm1572_vm15, %v2793_v30, 0.0 }
0x130a   :  { %v1576_v39 = vrot.slane %v1575_v10, 4 }
0x130b   :  { %1978 = vtanh.f32 %v1457_v43  ;;  %v1825_v47 = vmul.f32 -1.442695, %v1457_v43 }
0x130c   :  { %v1577_v43 = vadd.f32 %v1576_v39, %v1575_v10  ;;  %v1725_v10 = vld [vmem:[%s2871_s12 + $0x18] sm:$0xff]  ;;  %v1724_v39 = vld [vmem:[%s2871_s12 + $0x10] sm:$0xff] }
0x130d   :  { %1980 = vpow2.f32 %v1825_v47  ;;  %1747 = vmatpush.msrb.mxu2 %v1725_v10 }
0x130f   :  { %1748 = vmatpush.msrb.mxu2 %v1724_v39 }
0x1311   :  { %v1979_v28 = vpop.eup %1978 }
0x1312   :  { %1480 = vrot.lane.b32.xlu1 %v1979_v28, %s2132_s0  ;;  %v1578_v28 = vrot.slane %v1577_v43, 2 }
0x1313   :  { %v1981_v23 = vpop.eup %1980 }
0x1314   :  { %v1461_v48 = vadd.f32 1.0, %v1981_v23  ;;  %v1579_v47 = vadd.f32 %v1578_v28, %v1577_v43  ;;  %v1723_v43 = vld [vmem:[%s2871_s12 + $0x8] sm:$0xff]  ;;  %v1722_v28 = vld [vmem:[%s2871_s12] sm:$0xff] }
0x1315   :  { %1749 = vmatpush.msrb.mxu2 %v1723_v43 }
0x1316   :  { %1982 = vrcp.f32 %v1461_v48  ;;  %v1473_v51 = vand.u32 2147483648, %v1461_v48  ;;  %vm1467_vm8 = vweird.f32 %v1461_v48  ;;  %v1471_v62 = vand.u32 2147483647, %v1461_v48 }
0x1317   :  { %v1580_v23 = vrot.slane %v1579_v47, 1  ;;  %1750 = vmatpush.msrb.mxu2 %v1722_v28 }
0x1318   :  { %v1474_v44 = vor.u32 1.1754944e-38, %v1473_v51  ;;  %vm1472_vm6 = vcmp.eq.f32.partialorder %v1471_v62, 8.507059e+37 }
0x131c   :  { %v1983_v32 = vpop.eup %1982 }
0x131d   :  { %v1463_v54 = vmul.f32 %v1983_v32, %v1461_v48  ;;  %vm1468_vm12 = vweird.f32 %v1983_v32  ;;  %v1581_v48 = vadd.f32 %v1580_v23, %v1579_v47 }
0x131e   :  { %vm1469_vm9 = vmor %vm1467_vm8, %vm1468_vm12 }
0x131f   :  { %v1464_v55 = vsub.f32 1.0, %v1463_v54 }
0x1321   :  { %v1465_v20 = vmul.f32 %v1983_v32, %v1464_v55 }
0x1323   :  { %v1466_v59 = vadd.f32 %v1983_v32, %v1465_v20 }
0x1325   :  { %v1470_v6 = vsel %vm1469_vm9, %v1983_v32, %v1466_v59 }
0x1326   :  { %v1475_v36 = vsel %vm1472_vm6, %v1474_v44, %v1470_v6 }
0x1327   :  { %v1478_v17 = vmul.f32 0.0, %v1475_v36 }
0x1384   :  { %v1481_v31 = vpop.permute.xlu1 %1480 }
0x1385   :  { %v1483_v1 = vmul.f32 %v1481_v31, %v1475_v36 }
0x1387   :  { %1485 = vrot.lane.b32.xlu2 %v1483_v1, %s2134_s1 }
0x13e1   :  { %v1486_v58 = vpop.permute.xlu2 %1485 }
0x13e2   :  { %v1488_v5 = vadd.f32 %v1486_v58, %v1478_v17 }
0x13e4   :  { %1984 = vtanh.f32 %v1488_v5 }
0x13ea   :  { %v1985_v53 = vpop.eup %1984 }
0x13eb   :  { %1491 = vrot.lane.b32.xlu0 %v1985_v53, %s2132_s0 }
0x145d   :  { %v1492_v2 = vpop.permute.xlu0 %1491 }
0x145e   :  { %v1494_v11 = vmul.f32 %v1492_v2, %v1475_v36 }
0x1460   :  { %1508 = vrot.lane.b32.xlu1 %v1494_v11, %s2134_s1  ;;  %v1495_v29 = vperm.slane %v1494_v11, 0 }
0x1462   :  { %v1496_v34 = vsel %vm1427_vm11, %v1495_v29, 0.0  ;;  %vm1647_vm11 = vcmp.eq.s32.totalorder %v2787_v3, 3 }
0x14d2   :  { %v1509_v25 = vpop.permute.xlu1 %1508 }
0x14d3   :  { %1826 = vmatmul.msk.f32.vlgmr.msra.gmra.mxu3 %vm263_vm13, %v1509_v25 }
0x1556   :  { %v1529_v57 = vpop.f32.mrf.mxu3 }
0x1557   :  { %v1532_v0 = vadd.f32 %v1529_v57, %v1506_v37 }
0x1559   :  { %1986 = vtanh.f32 %v1532_v0  ;;  %v1827_v15 = vmul.f32 -1.442695, %v1532_v0  ;;  %v1650_v0 = vsel %vm1647_vm11, %v2793_v30, 0.0 }
0x155b   :  { %1988 = vpow2.f32 %v1827_v15 }
0x155f   :  { %v1987_v63 = vpop.eup %1986 }
0x1560   :  { %1555 = vrot.lane.b32.xlu2 %v1987_v63, %s2132_s0  ;;  %v1651_v63 = vrot.slane %v1650_v0, 4 }
0x1561   :  { %v1989_v13 = vpop.eup %1988 }
0x1562   :  { %v1536_v46 = vadd.f32 1.0, %v1989_v13  ;;  %v1652_v15 = vadd.f32 %v1651_v63, %v1650_v0 }
0x1564   :  { %1990 = vrcp.f32 %v1536_v46  ;;  %v1548_v49 = vand.u32 2147483648, %v1536_v46  ;;  %vm1542_vm7 = vweird.f32 %v1536_v46  ;;  %v1546_v19 = vand.u32 2147483647, %v1536_v46 }
0x1565   :  { %v1653_v13 = vrot.slane %v1652_v15, 2 }
0x1566   :  { %v1549_v21 = vor.u32 1.1754944e-38, %v1548_v49  ;;  %vm1547_vm2 = vcmp.eq.f32.partialorder %v1546_v19, 8.507059e+37 }
0x156a   :  { %v1991_v16 = vpop.eup %1990 }
0x156b   :  { %v1538_v27 = vmul.f32 %v1991_v16, %v1536_v46  ;;  %vm1543_vm1 = vweird.f32 %v1991_v16  ;;  %v1654_v46 = vadd.f32 %v1653_v13, %v1652_v15 }
0x156c   :  { %vm1544_vm10 = vmor %vm1542_vm7, %vm1543_vm1 }
0x156d   :  { %v1539_v12 = vsub.f32 1.0, %v1538_v27 }
0x156f   :  { %v1540_v18 = vmul.f32 %v1991_v16, %v1539_v12 }
0x1571   :  { %v1541_v7 = vadd.f32 %v1991_v16, %v1540_v18 }
0x1573   :  { %v1545_v41 = vsel %vm1544_vm10, %v1991_v16, %v1541_v7  ;;  %v1655_v16 = vrot.slane %v1654_v46, 1 }
0x1574   :  { %v1550_v42 = vsel %vm1547_vm2, %v1549_v21, %v1545_v41 }
0x1575   :  { %v1553_v52 = vmul.f32 %v1550_v42, %v1488_v5  ;;  %v1656_v27 = vadd.f32 %v1655_v16, %v1654_v46 }
0x15ba   :  { %v1556_v56 = vpop.permute.xlu2 %1555 }
0x15bb   :  { %v1558_v60 = vmul.f32 %v1556_v56, %v1550_v42 }
0x15bd   :  { %1560 = vrot.lane.b32.xlu0 %v1558_v60, %s2134_s1 }
0x162f   :  { %v1561_v22 = vpop.permute.xlu0 %1560 }
0x1630   :  { %v1563_v35 = vadd.f32 %v1561_v22, %v1553_v52 }
0x1632   :  { %1992 = vtanh.f32 %v1563_v35 }
0x1638   :  { %v1993_v26 = vpop.eup %1992 }
0x1639   :  { %1566 = vrot.lane.b32.xlu1 %v1993_v26, %s2132_s0 }
0x16ab   :  { %v1567_v9 = vpop.permute.xlu1 %1566 }
0x16ac   :  { %v1569_v33 = vmul.f32 %v1567_v9, %v1550_v42 }
0x16ae   :  { %v1570_v24 = vperm.slane %v1569_v33, 0  ;;  %1583 = vrot.lane.b32.xlu2 %v1569_v33, %s2134_s1 }
0x16b0   :  { %v1571_v40 = vsel %vm1497_vm14, %v1570_v24, %v1496_v34  ;;  %vm1755_vm14 = vcmask 15360  }
0x1708   :  { %v1584_v38 = vpop.permute.xlu2 %1583 }
0x1709   :  { %1828 = vmatmul.msk.f32.vlgmr.msra.gmra.mxu0 %vm263_vm13, %v1584_v38 }
0x1786   :  { %v1604_v32 = vpop.f32.mrf.mxu0 }
0x1787   :  { %v1607_v54 = vadd.f32 %v1604_v32, %v1581_v48 }
0x1789   :  { %1994 = vtanh.f32 %v1607_v54  ;;  %v1829_v20 = vmul.f32 -1.442695, %v1607_v54 }
0x178b   :  { %1996 = vpow2.f32 %v1829_v20 }
0x178f   :  { %v1995_v55 = vpop.eup %1994 }
0x1790   :  { %1630 = vrot.lane.b32.xlu0 %v1995_v55, %s2132_s0  ;;  %v1849_v55 = vld [vmem:[%s2872_s13] ss:$0 sm:$0xff] }
0x1791   :  { %v1997_v59 = vpop.eup %1996 }
0x1792   :  { %v1611_v51 = vadd.f32 1.0, %v1997_v59 }
0x1794   :  { %1998 = vrcp.f32 %v1611_v51  ;;  %v1623_v1 = vand.u32 2147483648, %v1611_v51  ;;  %vm1617_vm3 = vweird.f32 %v1611_v51  ;;  %v1621_v17 = vand.u32 2147483647, %v1611_v51 }
0x1796   :  { %v1624_v5 = vor.u32 1.1754944e-38, %v1623_v1  ;;  %vm1622_vm5 = vcmp.eq.f32.partialorder %v1621_v17, 8.507059e+37 }
0x179a   :  { %v1999_v62 = vpop.eup %1998 }
0x179b   :  { %v1613_v6 = vmul.f32 %v1999_v62, %v1611_v51  ;;  %vm1618_vm0 = vweird.f32 %v1999_v62 }
0x179c   :  { %vm1619_vm4 = vmor %vm1617_vm3, %vm1618_vm0 }
0x179d   :  { %v1614_v44 = vsub.f32 1.0, %v1613_v6 }
0x179f   :  { %v1615_v31 = vmul.f32 %v1999_v62, %v1614_v44 }
0x17a1   :  { %v1616_v36 = vadd.f32 %v1999_v62, %v1615_v31 }
0x17a3   :  { %v1620_v58 = vsel %vm1619_vm4, %v1999_v62, %v1616_v36 }
0x17a4   :  { %v1625_v2 = vsel %vm1622_vm5, %v1624_v5, %v1620_v58 }
0x17a5   :  { %v1628_v25 = vmul.f32 %v1625_v2, %v1563_v35 }
0x1802   :  { %v1631_v53 = vpop.permute.xlu0 %1630 }
0x1803   :  { %v1633_v11 = vmul.f32 %v1631_v53, %v1625_v2 }
0x1805   :  { %1635 = vrot.lane.b32.xlu1 %v1633_v11, %s2134_s1 }
0x1877   :  { %v1636_v14 = vpop.permute.xlu1 %1635 }
0x1878   :  { %v1638_v61 = vadd.f32 %v1636_v14, %v1628_v25 }
0x187a   :  { %2000 = vtanh.f32 %v1638_v61 }
0x1880   :  { %v2001_v8 = vpop.eup %2000 }
0x1881   :  { %1641 = vrot.lane.b32.xlu2 %v2001_v8, %s2132_s0 }
0x18db   :  { %v1642_v45 = vpop.permute.xlu2 %1641 }
0x18dc   :  { %v1644_v50 = vmul.f32 %v1642_v45, %v1625_v2 }
0x18de   :  { %v1645_v4 = vperm.slane %v1644_v50, 0  ;;  %1658 = vrot.lane.b32.xlu0 %v1644_v50, %s2134_s1 }
0x18e0   :  { %v1646_v37 = vsel %vm1572_vm15, %v1645_v4, %v1571_v40 }
0x1950   :  { %v1659_v57 = vpop.permute.xlu0 %1658 }
0x1951   :  { %1830 = vmatmul.msk.f32.vlgmr.msra.gmra.mxu1 %vm263_vm13, %v1659_v57 }
0x19ce   :  { %v1679_v12 = vpop.f32.mrf.mxu1 }
0x19cf   :  { %v1682_v18 = vadd.f32 %v1679_v12, %v1656_v27 }
0x19d1   :  { %2002 = vtanh.f32 %v1682_v18  ;;  %v1831_v49 = vmul.f32 -1.442695, %v1682_v18 }
0x19d3   :  { %2004 = vpow2.f32 %v1831_v49 }
0x19d7   :  { %v2003_v7 = vpop.eup %2002 }
0x19d8   :  { %1705 = vrot.lane.b32.xlu1 %v2003_v7, %s2132_s0 }
0x19d9   :  { %v2005_v19 = vpop.eup %2004 }
0x19da   :  { %v1686_v41 = vadd.f32 1.0, %v2005_v19 }
0x19dc   :  { %2006 = vrcp.f32 %v1686_v41  ;;  %v1698_v52 = vand.u32 2147483648, %v1686_v41  ;;  %vm1692_vm8 = vweird.f32 %v1686_v41  ;;  %v1696_v22 = vand.u32 2147483647, %v1686_v41 }
0x19de   :  { %v1699_v26 = vor.u32 1.1754944e-38, %v1698_v52  ;;  %vm1697_vm6 = vcmp.eq.f32.partialorder %v1696_v22, 8.507059e+37 }
0x19e2   :  { %v2007_v21 = vpop.eup %2006 }
0x19e3   :  { %v1688_v56 = vmul.f32 %v2007_v21, %v1686_v41  ;;  %vm1693_vm12 = vweird.f32 %v2007_v21 }
0x19e4   :  { %vm1694_vm9 = vmor %vm1692_vm8, %vm1693_vm12 }
0x19e5   :  { %v1689_v30 = vsub.f32 1.0, %v1688_v56 }
0x19e7   :  { %v1690_v42 = vmul.f32 %v2007_v21, %v1689_v30 }
0x19e9   :  { %v1691_v60 = vadd.f32 %v2007_v21, %v1690_v42 }
0x19eb   :  { %v1695_v35 = vsel %vm1694_vm9, %v2007_v21, %v1691_v60 }
0x19ec   :  { %v1700_v9 = vsel %vm1697_vm6, %v1699_v26, %v1695_v35 }
0x19ed   :  { %v1703_v24 = vmul.f32 %v1700_v9, %v1638_v61 }
0x1a4a   :  { %v1706_v29 = vpop.permute.xlu1 %1705 }
0x1a4b   :  { %v1708_v33 = vmul.f32 %v1706_v29, %v1700_v9 }
0x1a4d   :  { %1710 = vrot.lane.b32.xlu2 %v1708_v33, %s2134_s1 }
0x1aa7   :  { %v1711_v34 = vpop.permute.xlu2 %1710 }
0x1aa8   :  { %v1713_v40 = vadd.f32 %v1711_v34, %v1703_v24 }
0x1aaa   :  { %2008 = vtanh.f32 %v1713_v40 }
0x1ab0   :  { %v2009_v38 = vpop.eup %2008 }
0x1ab1   :  { %1716 = vrot.lane.b32.xlu0 %v2009_v38, %s2132_s0 }
0x1b23   :  { %v1717_v47 = vpop.permute.xlu0 %1716 }
0x1b24   :  { %v1719_v23 = vmul.f32 %v1717_v47, %v1700_v9 }
0x1b26   :  { %v1720_v48 = vperm.slane %v1719_v23, 0 }
0x1b28   :  { %v1721_v32 = vsel %vm1647_vm11, %v1720_v48, %v1646_v37 }
0x1b29   :  { %1731 = vrot.lane.b32.xlu1 %v1721_v32, %s2134_s1 }
0x1b9b   :  { %v1732_v54 = vpop.permute.xlu1 %1731 }
0x1b9c   :  { %1832 = vmatmul.msk.f32.vlgmr.msrb.gmra.mxu2 %vm263_vm13, %v1732_v54 }
0x1c1f   :  { %v1752_v20 = vpop.f32.mrf.mxu2 }
0x1c20   :  { %v1753_v59 = vadd.f32 %v1849_v55, %v1752_v20 }
0x1c22   :  { %v1756_v51 = vsel %vm1755_vm14, %v1753_v59, -inf }
0x1c23   :  { %1757 = vmax.xlane.f32.xlu2 %v1756_v51 }
0x1c96   :  { %v1758_v62 = vpop.xlane.xlu2 %1757 }
0x1c97   :  { %v1759_v6 = vsub.f32 %v1753_v59, %v1758_v62 }
0x1c99   :  { %v1760_v44 = vmul.f32 1.442695, %v1759_v6 }
0x1c9b   :  { %2010 = vpow2.f32 %v1760_v44 }
0x1ca1   :  { %v2011_v3 = vpop.eup %2010 }
0x1ca2   :  { %v1762_v31 = vsel %vm1755_vm14, %v2011_v3, 0.0 }
0x1ca3   :  { %1763 = vadd.xlane.f32.xlu0 %v1762_v31 }
0x1d16   :  { %v1764_v36 = vpop.xlane.xlu0 %1763 }
0x1d17   :  { %2012 = vlog2.f32 %v1764_v36 }
0x1d1d   :  { %v2013_v1 = vpop.eup %2012 }
0x1d1e   :  { %v1766_v17 = vmul.f32 0.6931472, %v2013_v1 }
0x1d20   :  { %v1767_v58 = vadd.f32 %v1766_v17, %v1758_v62 }
0x1d22   :  { %v1768_v5 = vsub.f32 %v1753_v59, %v1767_v58 }
0x1d24   :  { %1769 = vst.msk [vmem:[%s2873_s14] sm:$0xff] %vm1755_vm14, %v1768_v5 }
0x1d25   :  { %1774 = vsyncpa [#allocation5], 1 }
0x1d26   :  { %1775 = vsyncpa [#allocation7], 1 }
0x1d27   :  { %1776 = vsyncpa [#allocation10], 1 }

</bundles_post_ra>
